<compile_context>
chip_gen: v5e
topology: v5e:2x2
jax: 0.10.0
libtpu: 0.0.40
codegen_flags: <defaults>
</compile_context>

<pallas_src>
import math

import jax
import jax.numpy as jnp
from jax.experimental import pallas as pl
from jax.experimental.pallas import tpu as pltpu

# ---- small synthetic config (BERT-like) ----
B, S = 2, 8              # batch, sequence length
H, NH = 32, 4            # hidden size, num attention heads
DH = H // NH             # head dim
I = 64                   # FFN intermediate size
N_LAYERS = 2
VOCAB = 64
MAXPOS = 16
NUM_LABELS = 3
LN_EPS = 1e-12
ATT_SCALE = 1.0 / math.sqrt(DH)


# ----------------------------- in-kernel helpers -----------------------------
def _layernorm(x, gamma, beta):
    mu = jnp.mean(x, axis=-1, keepdims=True)
    var = jnp.mean((x - mu) ** 2, axis=-1, keepdims=True)
    return (x - mu) * jax.lax.rsqrt(var + LN_EPS) * gamma + beta


def _gelu(x):
    # TODO(synk): HF BERT default is exact erf-GELU; tanh approximation used for robust Mosaic lowering.
    return jax.nn.gelu(x, approximate=True)


# ----------------------------- fused forward kernel -----------------------------
def fused_forward_kernel(we_ref, pe_ref, te_ref, mask_ref, embg_ref, embb_ref,
                         wqkv_ref, bqkv_ref, wo_ref, bo_ref, ln1g_ref, ln1b_ref,
                         w1_ref, b1_ref, w2_ref, b2_ref, ln2g_ref, ln2b_ref,
                         wp_ref, bp_ref, wc_ref, bc_ref, labels_ref,
                         logits_ref, loss_ref):
    """Embeddings LN -> N_LAYERS x encoder layer -> pooler -> classifier -> CE loss."""
    # ---- embeddings: sum + LayerNorm (fused; no HBM materialization of emb) ----
    emb = (we_ref[...] + pe_ref[...] + te_ref[...]).astype(jnp.float32)      # (B,S,H)
    hs = _layernorm(emb, embg_ref[...], embb_ref[...]).reshape(B * S, H)     # (B*S,H)

    addmask = mask_ref[...]                                                  # (NH*B,1,S), head-major

    # ---- encoder layers: hidden state stays resident, weights indexed statically ----
    for l in range(N_LAYERS):
        # fused QKV projection: one (B*S,H) x (H,3H) MXU push + one bias add
        qkv = jnp.dot(hs, wqkv_ref[l], preferred_element_type=jnp.float32) + bqkv_ref[l]
        q3 = qkv[:, 0 * H:1 * H].reshape(B, S, H)
        k3 = qkv[:, 1 * H:2 * H].reshape(B, S, H)
        v3 = qkv[:, 2 * H:3 * H].reshape(B, S, H)

        # stack heads along the major (batch) axis -> (NH*B, S, DH); then all heads are
        # handled by two batched einsums instead of a per-head matmul loop.
        qh = jnp.concatenate([q3[:, :, hd * DH:(hd + 1) * DH] for hd in range(NH)], axis=0)
        kh = jnp.concatenate([k3[:, :, hd * DH:(hd + 1) * DH] for hd in range(NH)], axis=0)
        vh = jnp.concatenate([v3[:, :, hd * DH:(hd + 1) * DH] for hd in range(NH)], axis=0)

        sc = jnp.einsum('nqd,nkd->nqk', qh, kh,
                        preferred_element_type=jnp.float32) * ATT_SCALE      # (NH*B,S,S)
        sc = sc + addmask                                                    # broadcast over query axis
        sc = sc - jnp.max(sc, axis=-1, keepdims=True)
        p = jnp.exp(sc)
        # softmax normalization on the EUP slot (approx reciprocal) instead of a VALU divide
        p = p * pl.reciprocal(jnp.sum(p, axis=-1, keepdims=True), approx=True)
        ctx = jnp.einsum('nqk,nkd->nqd', p, vh,
                         preferred_element_type=jnp.float32)                 # (NH*B,S,DH)

        # merge heads back: (NH*B,S,DH) -> (B,S,H) -> (B*S,H)
        ctx = jnp.concatenate([ctx[hd * B:(hd + 1) * B] for hd in range(NH)], axis=-1)
        ctx = ctx.reshape(B * S, H)

        attn_out = jnp.dot(ctx, wo_ref[l], preferred_element_type=jnp.float32) + bo_ref[l]
        h1 = _layernorm(hs + attn_out, ln1g_ref[l], ln1b_ref[l])

        ffn = _gelu(jnp.dot(h1, w1_ref[l], preferred_element_type=jnp.float32) + b1_ref[l])
        ffn = jnp.dot(ffn, w2_ref[l], preferred_element_type=jnp.float32) + b2_ref[l]
        hs = _layernorm(h1 + ffn, ln2g_ref[l], ln2b_ref[l])

    # ---- pooler (tanh on [CLS]) + classifier + mean cross-entropy ----
    cls = hs.reshape(B, S, H)[:, 0, :]                                       # (B,H)
    pooled = jnp.tanh(jnp.dot(cls, wp_ref[...],
                              preferred_element_type=jnp.float32) + bp_ref[...])
    logits = jnp.dot(pooled, wc_ref[...],
                     preferred_element_type=jnp.float32) + bc_ref[...]       # (B,NUM_LABELS)
    logits_ref[...] = logits.astype(logits_ref.dtype)

    m = jnp.max(logits, axis=-1, keepdims=True)
    lse = jnp.log(jnp.sum(jnp.exp(logits - m), axis=-1, keepdims=True)) + m
    logp = logits - lse                                                      # (B,NUM_LABELS)
    labels = labels_ref[...]                                                 # (B,1) int32
    onehot = (jax.lax.broadcasted_iota(jnp.int32, (B, NUM_LABELS), 1)
              == labels).astype(jnp.float32)
    loss_ref[...] = (-jnp.sum(onehot * logp) / B).reshape(1, 1)


# ----------------------------- pallas_call wrapper -----------------------------
def _vmem_specs(n):
    return [pl.BlockSpec(memory_space=pltpu.MemorySpace.VMEM) for _ in range(n)]


_N_INPUTS = 23   # we, pe, te, mask, emb_ln(2), 12 stacked layer params, head(4), labels

_fused_forward = pl.pallas_call(
    fused_forward_kernel,
    out_shape=(jax.ShapeDtypeStruct((B, NUM_LABELS), jnp.float32),
               jax.ShapeDtypeStruct((1, 1), jnp.float32)),
    in_specs=_vmem_specs(_N_INPUTS),
    out_specs=(pl.BlockSpec(memory_space=pltpu.MemorySpace.VMEM),
               pl.BlockSpec(memory_space=pltpu.MemorySpace.VMEM)),
)


# ----------------------------- parameters -----------------------------
def init_params(key):
    def nrm(k, shape):
        return jax.random.normal(k, shape, jnp.float32) * 0.02

    keys = jax.random.split(key, 9)
    params = {
        "word_emb": nrm(keys[0], (VOCAB, H)),
        "pos_emb": nrm(keys[1], (MAXPOS, H)),
        "type_emb": nrm(keys[2], (2, H)),
        "emb_ln_g": jnp.ones((1, H), jnp.float32),
        "emb_ln_b": jnp.zeros((1, H), jnp.float32),
        "pooler_w": nrm(keys[3], (H, H)),
        "pooler_b": jnp.zeros((1, H), jnp.float32),
        "cls_w": nrm(keys[4], (H, NUM_LABELS)),
        "cls_b": jnp.zeros((1, NUM_LABELS), jnp.float32),
        # per-layer weights stacked along a leading layer axis so the whole encoder
        # lives in one kernel; QKV packed as [Wq | Wk | Wv] along the output axis.
        "layers": {
            "wqkv": nrm(keys[5], (N_LAYERS, H, 3 * H)),
            "bqkv": jnp.zeros((N_LAYERS, 1, 3 * H), jnp.float32),
            "wo": nrm(keys[6], (N_LAYERS, H, H)),
            "bo": jnp.zeros((N_LAYERS, 1, H), jnp.float32),
            "ln1g": jnp.ones((N_LAYERS, 1, H), jnp.float32),
            "ln1b": jnp.zeros((N_LAYERS, 1, H), jnp.float32),
            "w1": nrm(keys[7], (N_LAYERS, H, I)),
            "b1": jnp.zeros((N_LAYERS, 1, I), jnp.float32),
            "w2": nrm(keys[8], (N_LAYERS, I, H)),
            "b2": jnp.zeros((N_LAYERS, 1, H), jnp.float32),
            "ln2g": jnp.ones((N_LAYERS, 1, H), jnp.float32),
            "ln2b": jnp.zeros((N_LAYERS, 1, H), jnp.float32),
        },
    }
    return params


# ----------------------------- forward (glue + fused kernel) -----------------------------
def sentiment_classifier_forward(params, input_ids, attention_mask, labels):
    """Returns (logits, loss) — equivalent of ModelOutput(logits, loss)."""
    # Embedding table gathers stay in plain JAX glue; everything else is one fused kernel.
    we = params["word_emb"][input_ids]                               # (B,S,H)
    pe = params["pos_emb"][jnp.arange(S)][None, :, :]                # (1,S,H)
    # TODO(synk): token_type_ids hard-coded to type 0 (matches the synthetic setup).
    te = params["type_emb"][0][None, None, :]                        # (1,1,H)

    # additive attention mask, replicated per head (head-major order, matching the
    # head stacking along axis 0 inside the kernel)
    addmask = ((1.0 - attention_mask.astype(jnp.float32)) * -1e9)[:, None, :]   # (B,1,S)
    addmask_h = jnp.tile(addmask, (NH, 1, 1))                                   # (NH*B,1,S)

    L = params["layers"]
    logits, loss = _fused_forward(
        we, pe, te, addmask_h,
        params["emb_ln_g"], params["emb_ln_b"],
        L["wqkv"], L["bqkv"], L["wo"], L["bo"], L["ln1g"], L["ln1b"],
        L["w1"], L["b1"], L["w2"], L["b2"], L["ln2g"], L["ln2b"],
        params["pooler_w"], params["pooler_b"], params["cls_w"], params["cls_b"],
        labels.astype(jnp.int32).reshape(B, 1))
    return logits, loss[0, 0]


# ----------------------------- main -----------------------------
if __name__ == "__main__":
    key = jax.random.PRNGKey(0)
    kp, kids, kmask, klab = jax.random.split(key, 4)

    params = init_params(kp)

    input_ids = jax.random.randint(kids, (B, S), 0, VOCAB, dtype=jnp.int32)
    # attention_mask: first row fully attended, second row has 2 padding positions.
    attention_mask = jnp.array([[1] * S, [1] * (S - 2) + [0, 0]], dtype=jnp.int32)
    labels = jax.random.randint(klab, (B,), 0, NUM_LABELS, dtype=jnp.int32)

    fwd = jax.jit(sentiment_classifier_forward)
    logits, loss = fwd(params, input_ids, attention_mask, labels)
    jax.block_until_ready((logits, loss))

    assert logits.shape == (B, NUM_LABELS)
    assert loss.shape == ()
    assert bool(jnp.all(jnp.isfinite(logits))) and bool(jnp.isfinite(loss))
    print("KERNEL_OK")
</pallas_src>

<mosaic_0001>
module attributes {stable_mosaic.version = 11 : i64} {
  func.func @fused_forward_kernel(%arg0: memref<2x8x32xf32, #tpu.memory_space<vmem>>, %arg1: memref<1x8x32xf32, #tpu.memory_space<vmem>>, %arg2: memref<1x1x32xf32, #tpu.memory_space<vmem>>, %arg3: memref<8x1x8xf32, #tpu.memory_space<vmem>>, %arg4: memref<1x32xf32, #tpu.memory_space<vmem>>, %arg5: memref<1x32xf32, #tpu.memory_space<vmem>>, %arg6: memref<2x32x96xf32, #tpu.memory_space<vmem>>, %arg7: memref<2x1x96xf32, #tpu.memory_space<vmem>>, %arg8: memref<2x32x32xf32, #tpu.memory_space<vmem>>, %arg9: memref<2x1x32xf32, #tpu.memory_space<vmem>>, %arg10: memref<2x1x32xf32, #tpu.memory_space<vmem>>, %arg11: memref<2x1x32xf32, #tpu.memory_space<vmem>>, %arg12: memref<2x32x64xf32, #tpu.memory_space<vmem>>, %arg13: memref<2x1x64xf32, #tpu.memory_space<vmem>>, %arg14: memref<2x64x32xf32, #tpu.memory_space<vmem>>, %arg15: memref<2x1x32xf32, #tpu.memory_space<vmem>>, %arg16: memref<2x1x32xf32, #tpu.memory_space<vmem>>, %arg17: memref<2x1x32xf32, #tpu.memory_space<vmem>>, %arg18: memref<32x32xf32, #tpu.memory_space<vmem>>, %arg19: memref<1x32xf32, #tpu.memory_space<vmem>>, %arg20: memref<32x3xf32, #tpu.memory_space<vmem>>, %arg21: memref<1x3xf32, #tpu.memory_space<vmem>>, %arg22: memref<2x1xi32, #tpu.memory_space<vmem>>, %arg23: memref<2x3xf32, #tpu.memory_space<vmem>>, %arg24: memref<1x1xf32, #tpu.memory_space<vmem>>) attributes {dimension_semantics = [], scalar_prefetch = 0 : i64, scratch_operands = 0 : i64, tpu.core_type = #tpu.core_type<tc>} {
    %c0 = arith.constant 0 : index
    %c0_0 = arith.constant 0 : index
    %c0_1 = arith.constant 0 : index
    %0 = vector.load %arg0[%c0, %c0_0, %c0_1] : memref<2x8x32xf32, #tpu.memory_space<vmem>>, vector<2x8x32xf32>
    %c0_2 = arith.constant 0 : index
    %c0_3 = arith.constant 0 : index
    %c0_4 = arith.constant 0 : index
    %1 = vector.load %arg1[%c0_2, %c0_3, %c0_4] : memref<1x8x32xf32, #tpu.memory_space<vmem>>, vector<1x8x32xf32>
    %2 = vector.broadcast %1 : vector<1x8x32xf32> to vector<2x8x32xf32>
    %3 = arith.addf %0, %2 : vector<2x8x32xf32>
    %c0_5 = arith.constant 0 : index
    %c0_6 = arith.constant 0 : index
    %c0_7 = arith.constant 0 : index
    %4 = vector.load %arg2[%c0_5, %c0_6, %c0_7] : memref<1x1x32xf32, #tpu.memory_space<vmem>>, vector<1x1x32xf32>
    %5 = vector.broadcast %4 : vector<1x1x32xf32> to vector<2x8x32xf32>
    %6 = arith.addf %3, %5 : vector<2x8x32xf32>
    %c0_8 = arith.constant 0 : index
    %c0_9 = arith.constant 0 : index
    %7 = vector.load %arg4[%c0_8, %c0_9] : memref<1x32xf32, #tpu.memory_space<vmem>>, vector<1x32xf32>
    %c0_10 = arith.constant 0 : index
    %c0_11 = arith.constant 0 : index
    %8 = vector.load %arg5[%c0_10, %c0_11] : memref<1x32xf32, #tpu.memory_space<vmem>>, vector<1x32xf32>
    %cst = arith.constant dense<0.000000e+00> : vector<2x8xf32>
    %9 = vector.multi_reduction <add>, %6, %cst [2] : vector<2x8x32xf32> to vector<2x8xf32>
    %10 = vector.shape_cast %9 : vector<2x8xf32> to vector<2x8x1xf32>
    %cst_12 = arith.constant 3.200000e+01 : f32
    %11 = vector.broadcast %cst_12 : f32 to vector<2x8x1xf32>
    %12 = arith.divf %10, %11 : vector<2x8x1xf32>
    %13 = vector.broadcast %12 : vector<2x8x1xf32> to vector<2x8x32xf32>
    %14 = arith.subf %6, %13 : vector<2x8x32xf32>
    %15 = arith.mulf %14, %14 : vector<2x8x32xf32>
    %cst_13 = arith.constant dense<0.000000e+00> : vector<2x8xf32>
    %16 = vector.multi_reduction <add>, %15, %cst_13 [2] : vector<2x8x32xf32> to vector<2x8xf32>
    %17 = vector.shape_cast %16 : vector<2x8xf32> to vector<2x8x1xf32>
    %cst_14 = arith.constant 3.200000e+01 : f32
    %18 = vector.broadcast %cst_14 : f32 to vector<2x8x1xf32>
    %19 = arith.divf %17, %18 : vector<2x8x1xf32>
    %20 = vector.broadcast %12 : vector<2x8x1xf32> to vector<2x8x32xf32>
    %21 = arith.subf %6, %20 : vector<2x8x32xf32>
    %cst_15 = arith.constant 9.99999996E-13 : f32
    %22 = vector.broadcast %cst_15 : f32 to vector<2x8x1xf32>
    %23 = arith.addf %19, %22 : vector<2x8x1xf32>
    %24 = math.rsqrt %23 : vector<2x8x1xf32>
    %25 = vector.broadcast %24 : vector<2x8x1xf32> to vector<2x8x32xf32>
    %26 = arith.mulf %21, %25 : vector<2x8x32xf32>
    %27 = vector.shape_cast %7 : vector<1x32xf32> to vector<1x1x32xf32>
    %28 = vector.broadcast %27 : vector<1x1x32xf32> to vector<2x8x32xf32>
    %29 = arith.mulf %26, %28 : vector<2x8x32xf32>
    %30 = vector.shape_cast %8 : vector<1x32xf32> to vector<1x1x32xf32>
    %31 = vector.broadcast %30 : vector<1x1x32xf32> to vector<2x8x32xf32>
    %32 = arith.addf %29, %31 : vector<2x8x32xf32>
    %33 = vector.shape_cast %32 : vector<2x8x32xf32> to vector<16x32xf32>
    %c0_16 = arith.constant 0 : index
    %c0_17 = arith.constant 0 : index
    %c0_18 = arith.constant 0 : index
    %34 = vector.load %arg3[%c0_16, %c0_17, %c0_18] : memref<8x1x8xf32, #tpu.memory_space<vmem>>, vector<8x1x8xf32>
    %c0_19 = arith.constant 0 : index
    %c0_20 = arith.constant 0 : index
    %c0_21 = arith.constant 0 : index
    %35 = vector.load %arg6[%c0_19, %c0_20, %c0_21] : memref<2x32x96xf32, #tpu.memory_space<vmem>>, vector<1x32x96xf32>
    %36 = vector.shape_cast %35 : vector<1x32x96xf32> to vector<32x96xf32>
    %cst_22 = arith.constant dense<0.000000e+00> : vector<16x96xf32>
    %37 = tpu.matmul %33, %36, %cst_22 {dimension_numbers = #tpu.dot_dimension_numbers<[1], [0], [0], [1], [0, 0, 1, 1], [], []>} : vector<16x32xf32>, vector<32x96xf32>, vector<16x96xf32> -> vector<16x96xf32>
    %c0_23 = arith.constant 0 : index
    %c0_24 = arith.constant 0 : index
    %c0_25 = arith.constant 0 : index
    %38 = vector.load %arg7[%c0_23, %c0_24, %c0_25] : memref<2x1x96xf32, #tpu.memory_space<vmem>>, vector<1x1x96xf32>
    %39 = vector.shape_cast %38 : vector<1x1x96xf32> to vector<1x96xf32>
    %40 = vector.broadcast %39 : vector<1x96xf32> to vector<16x96xf32>
    %41 = arith.addf %37, %40 : vector<16x96xf32>
    %42 = vector.extract_strided_slice %41 {offsets = [0, 0], sizes = [16, 32], strides = [1, 1]} : vector<16x96xf32> to vector<16x32xf32>
    %43 = vector.shape_cast %42 : vector<16x32xf32> to vector<2x8x32xf32>
    %44 = vector.extract_strided_slice %41 {offsets = [0, 32], sizes = [16, 32], strides = [1, 1]} : vector<16x96xf32> to vector<16x32xf32>
    %45 = vector.shape_cast %44 : vector<16x32xf32> to vector<2x8x32xf32>
    %46 = vector.extract_strided_slice %41 {offsets = [0, 64], sizes = [16, 32], strides = [1, 1]} : vector<16x96xf32> to vector<16x32xf32>
    %47 = vector.shape_cast %46 : vector<16x32xf32> to vector<2x8x32xf32>
    %48 = vector.extract_strided_slice %43 {offsets = [0, 0, 0], sizes = [2, 8, 8], strides = [1, 1, 1]} : vector<2x8x32xf32> to vector<2x8x8xf32>
    %49 = vector.extract_strided_slice %43 {offsets = [0, 0, 8], sizes = [2, 8, 8], strides = [1, 1, 1]} : vector<2x8x32xf32> to vector<2x8x8xf32>
    %50 = vector.extract_strided_slice %43 {offsets = [0, 0, 16], sizes = [2, 8, 8], strides = [1, 1, 1]} : vector<2x8x32xf32> to vector<2x8x8xf32>
    %51 = vector.extract_strided_slice %43 {offsets = [0, 0, 24], sizes = [2, 8, 8], strides = [1, 1, 1]} : vector<2x8x32xf32> to vector<2x8x8xf32>
    %52 = tpu.concatenate %48, %49, %50, %51 in 0 : vector<2x8x8xf32>, vector<2x8x8xf32>, vector<2x8x8xf32>, vector<2x8x8xf32> -> vector<8x8x8xf32>
    %53 = vector.extract_strided_slice %45 {offsets = [0, 0, 0], sizes = [2, 8, 8], strides = [1, 1, 1]} : vector<2x8x32xf32> to vector<2x8x8xf32>
    %54 = vector.extract_strided_slice %45 {offsets = [0, 0, 8], sizes = [2, 8, 8], strides = [1, 1, 1]} : vector<2x8x32xf32> to vector<2x8x8xf32>
    %55 = vector.extract_strided_slice %45 {offsets = [0, 0, 16], sizes = [2, 8, 8], strides = [1, 1, 1]} : vector<2x8x32xf32> to vector<2x8x8xf32>
    %56 = vector.extract_strided_slice %45 {offsets = [0, 0, 24], sizes = [2, 8, 8], strides = [1, 1, 1]} : vector<2x8x32xf32> to vector<2x8x8xf32>
    %57 = tpu.concatenate %53, %54, %55, %56 in 0 : vector<2x8x8xf32>, vector<2x8x8xf32>, vector<2x8x8xf32>, vector<2x8x8xf32> -> vector<8x8x8xf32>
    %58 = vector.extract_strided_slice %47 {offsets = [0, 0, 0], sizes = [2, 8, 8], strides = [1, 1, 1]} : vector<2x8x32xf32> to vector<2x8x8xf32>
    %59 = vector.extract_strided_slice %47 {offsets = [0, 0, 8], sizes = [2, 8, 8], strides = [1, 1, 1]} : vector<2x8x32xf32> to vector<2x8x8xf32>
    %60 = vector.extract_strided_slice %47 {offsets = [0, 0, 16], sizes = [2, 8, 8], strides = [1, 1, 1]} : vector<2x8x32xf32> to vector<2x8x8xf32>
    %61 = vector.extract_strided_slice %47 {offsets = [0, 0, 24], sizes = [2, 8, 8], strides = [1, 1, 1]} : vector<2x8x32xf32> to vector<2x8x8xf32>
    %62 = tpu.concatenate %58, %59, %60, %61 in 0 : vector<2x8x8xf32>, vector<2x8x8xf32>, vector<2x8x8xf32>, vector<2x8x8xf32> -> vector<8x8x8xf32>
    "tpu.trace_start"() <{level = 10 : i32, message = "nqd,nkd->nqk"}> : () -> ()
    %cst_26 = arith.constant dense<0.000000e+00> : vector<8x8x8xf32>
    %63 = tpu.matmul %52, %57, %cst_26 {dimension_numbers = #tpu.dot_dimension_numbers<[2], [2], [1], [1], [0, 0, 0, 1, 1, 1], [0], [0]>} : vector<8x8x8xf32>, vector<8x8x8xf32>, vector<8x8x8xf32> -> vector<8x8x8xf32>
    "tpu.trace_stop"() : () -> ()
    %cst_27 = arith.constant 0.353553385 : f32
    %64 = vector.broadcast %cst_27 : f32 to vector<8x8x8xf32>
    %65 = arith.mulf %63, %64 : vector<8x8x8xf32>
    %66 = vector.broadcast %34 : vector<8x1x8xf32> to vector<8x8x8xf32>
    %67 = arith.addf %65, %66 : vector<8x8x8xf32>
    %cst_28 = arith.constant dense<0xFF800000> : vector<8x8xf32>
    %68 = vector.multi_reduction <maximumf>, %67, %cst_28 [2] : vector<8x8x8xf32> to vector<8x8xf32>
    %69 = vector.shape_cast %68 : vector<8x8xf32> to vector<8x8x1xf32>
    %70 = vector.broadcast %69 : vector<8x8x1xf32> to vector<8x8x8xf32>
    %71 = arith.subf %67, %70 : vector<8x8x8xf32>
    %72 = math.exp %71 : vector<8x8x8xf32>
    %cst_29 = arith.constant dense<0.000000e+00> : vector<8x8xf32>
    %73 = vector.multi_reduction <add>, %72, %cst_29 [2] : vector<8x8x8xf32> to vector<8x8xf32>
    %74 = vector.shape_cast %73 : vector<8x8xf32> to vector<8x8x1xf32>
    %75 = tpu.reciprocal %74 {approx = true} : vector<8x8x1xf32> -> vector<8x8x1xf32>
    %76 = vector.broadcast %75 : vector<8x8x1xf32> to vector<8x8x8xf32>
    %77 = arith.mulf %72, %76 : vector<8x8x8xf32>
    "tpu.trace_start"() <{level = 10 : i32, message = "nqk,nkd->nqd"}> : () -> ()
    %cst_30 = arith.constant dense<0.000000e+00> : vector<8x8x8xf32>
    %78 = tpu.matmul %77, %62, %cst_30 {dimension_numbers = #tpu.dot_dimension_numbers<[2], [1], [1], [2], [0, 0, 0, 1, 1, 2], [0], [0]>} : vector<8x8x8xf32>, vector<8x8x8xf32>, vector<8x8x8xf32> -> vector<8x8x8xf32>
    "tpu.trace_stop"() : () -> ()
    %79 = vector.extract_strided_slice %78 {offsets = [0, 0, 0], sizes = [2, 8, 8], strides = [1, 1, 1]} : vector<8x8x8xf32> to vector<2x8x8xf32>
    %80 = vector.extract_strided_slice %78 {offsets = [2, 0, 0], sizes = [2, 8, 8], strides = [1, 1, 1]} : vector<8x8x8xf32> to vector<2x8x8xf32>
    %81 = vector.extract_strided_slice %78 {offsets = [4, 0, 0], sizes = [2, 8, 8], strides = [1, 1, 1]} : vector<8x8x8xf32> to vector<2x8x8xf32>
    %82 = vector.extract_strided_slice %78 {offsets = [6, 0, 0], sizes = [2, 8, 8], strides = [1, 1, 1]} : vector<8x8x8xf32> to vector<2x8x8xf32>
    %83 = tpu.concatenate %79, %80, %81, %82 in 2 : vector<2x8x8xf32>, vector<2x8x8xf32>, vector<2x8x8xf32>, vector<2x8x8xf32> -> vector<2x8x32xf32>
    %84 = vector.shape_cast %83 : vector<2x8x32xf32> to vector<16x32xf32>
    %c0_31 = arith.constant 0 : index
    %c0_32 = arith.constant 0 : index
    %c0_33 = arith.constant 0 : index
    %85 = vector.load %arg8[%c0_31, %c0_32, %c0_33] : memref<2x32x32xf32, #tpu.memory_space<vmem>>, vector<1x32x32xf32>
    %86 = vector.shape_cast %85 : vector<1x32x32xf32> to vector<32x32xf32>
    %cst_34 = arith.constant dense<0.000000e+00> : vector<16x32xf32>
    %87 = tpu.matmul %84, %86, %cst_34 {dimension_numbers = #tpu.dot_dimension_numbers<[1], [0], [0], [1], [0, 0, 1, 1], [], []>} : vector<16x32xf32>, vector<32x32xf32>, vector<16x32xf32> -> vector<16x32xf32>
    %c0_35 = arith.constant 0 : index
    %c0_36 = arith.constant 0 : index
    %c0_37 = arith.constant 0 : index
    %88 = vector.load %arg9[%c0_35, %c0_36, %c0_37] : memref<2x1x32xf32, #tpu.memory_space<vmem>>, vector<1x1x32xf32>
    %89 = vector.shape_cast %88 : vector<1x1x32xf32> to vector<1x32xf32>
    %90 = vector.broadcast %89 : vector<1x32xf32> to vector<16x32xf32>
    %91 = arith.addf %87, %90 : vector<16x32xf32>
    %92 = arith.addf %33, %91 : vector<16x32xf32>
    %c0_38 = arith.constant 0 : index
    %c0_39 = arith.constant 0 : index
    %c0_40 = arith.constant 0 : index
    %93 = vector.load %arg10[%c0_38, %c0_39, %c0_40] : memref<2x1x32xf32, #tpu.memory_space<vmem>>, vector<1x1x32xf32>
    %94 = vector.shape_cast %93 : vector<1x1x32xf32> to vector<1x32xf32>
    %c0_41 = arith.constant 0 : index
    %c0_42 = arith.constant 0 : index
    %c0_43 = arith.constant 0 : index
    %95 = vector.load %arg11[%c0_41, %c0_42, %c0_43] : memref<2x1x32xf32, #tpu.memory_space<vmem>>, vector<1x1x32xf32>
    %96 = vector.shape_cast %95 : vector<1x1x32xf32> to vector<1x32xf32>
    %cst_44 = arith.constant dense<0.000000e+00> : vector<16xf32>
    %97 = vector.multi_reduction <add>, %92, %cst_44 [1] : vector<16x32xf32> to vector<16xf32>
    %98 = vector.shape_cast %97 : vector<16xf32> to vector<16x1xf32>
    %cst_45 = arith.constant 3.200000e+01 : f32
    %99 = vector.broadcast %cst_45 : f32 to vector<16x1xf32>
    %100 = arith.divf %98, %99 : vector<16x1xf32>
    %101 = vector.broadcast %100 : vector<16x1xf32> to vector<16x32xf32>
    %102 = arith.subf %92, %101 : vector<16x32xf32>
    %103 = arith.mulf %102, %102 : vector<16x32xf32>
    %cst_46 = arith.constant dense<0.000000e+00> : vector<16xf32>
    %104 = vector.multi_reduction <add>, %103, %cst_46 [1] : vector<16x32xf32> to vector<16xf32>
    %105 = vector.shape_cast %104 : vector<16xf32> to vector<16x1xf32>
    %cst_47 = arith.constant 3.200000e+01 : f32
    %106 = vector.broadcast %cst_47 : f32 to vector<16x1xf32>
    %107 = arith.divf %105, %106 : vector<16x1xf32>
    %108 = vector.broadcast %100 : vector<16x1xf32> to vector<16x32xf32>
    %109 = arith.subf %92, %108 : vector<16x32xf32>
    %cst_48 = arith.constant 9.99999996E-13 : f32
    %110 = vector.broadcast %cst_48 : f32 to vector<16x1xf32>
    %111 = arith.addf %107, %110 : vector<16x1xf32>
    %112 = math.rsqrt %111 : vector<16x1xf32>
    %113 = vector.broadcast %112 : vector<16x1xf32> to vector<16x32xf32>
    %114 = arith.mulf %109, %113 : vector<16x32xf32>
    %115 = vector.broadcast %94 : vector<1x32xf32> to vector<16x32xf32>
    %116 = arith.mulf %114, %115 : vector<16x32xf32>
    %117 = vector.broadcast %96 : vector<1x32xf32> to vector<16x32xf32>
    %118 = arith.addf %116, %117 : vector<16x32xf32>
    %c0_49 = arith.constant 0 : index
    %c0_50 = arith.constant 0 : index
    %c0_51 = arith.constant 0 : index
    %119 = vector.load %arg12[%c0_49, %c0_50, %c0_51] : memref<2x32x64xf32, #tpu.memory_space<vmem>>, vector<1x32x64xf32>
    %120 = vector.shape_cast %119 : vector<1x32x64xf32> to vector<32x64xf32>
    %cst_52 = arith.constant dense<0.000000e+00> : vector<16x64xf32>
    %121 = tpu.matmul %118, %120, %cst_52 {dimension_numbers = #tpu.dot_dimension_numbers<[1], [0], [0], [1], [0, 0, 1, 1], [], []>} : vector<16x32xf32>, vector<32x64xf32>, vector<16x64xf32> -> vector<16x64xf32>
    %c0_53 = arith.constant 0 : index
    %c0_54 = arith.constant 0 : index
    %c0_55 = arith.constant 0 : index
    %122 = vector.load %arg13[%c0_53, %c0_54, %c0_55] : memref<2x1x64xf32, #tpu.memory_space<vmem>>, vector<1x1x64xf32>
    %123 = vector.shape_cast %122 : vector<1x1x64xf32> to vector<1x64xf32>
    %124 = vector.broadcast %123 : vector<1x64xf32> to vector<16x64xf32>
    %125 = arith.addf %121, %124 : vector<16x64xf32>
    %126 = arith.mulf %125, %125 : vector<16x64xf32>
    %127 = arith.mulf %125, %126 : vector<16x64xf32>
    %cst_56 = arith.constant 4.471500e-02 : f32
    %128 = vector.broadcast %cst_56 : f32 to vector<16x64xf32>
    %129 = arith.mulf %128, %127 : vector<16x64xf32>
    %130 = arith.addf %125, %129 : vector<16x64xf32>
    %cst_57 = arith.constant 0.797884583 : f32
    %131 = vector.broadcast %cst_57 : f32 to vector<16x64xf32>
    %132 = arith.mulf %131, %130 : vector<16x64xf32>
    %133 = math.tanh %132 : vector<16x64xf32>
    %cst_58 = arith.constant 1.000000e+00 : f32
    %134 = vector.broadcast %cst_58 : f32 to vector<16x64xf32>
    %135 = arith.addf %134, %133 : vector<16x64xf32>
    %cst_59 = arith.constant 5.000000e-01 : f32
    %136 = vector.broadcast %cst_59 : f32 to vector<16x64xf32>
    %137 = arith.mulf %136, %135 : vector<16x64xf32>
    %138 = arith.mulf %125, %137 : vector<16x64xf32>
    %c0_60 = arith.constant 0 : index
    %c0_61 = arith.constant 0 : index
    %c0_62 = arith.constant 0 : index
    %139 = vector.load %arg14[%c0_60, %c0_61, %c0_62] : memref<2x64x32xf32, #tpu.memory_space<vmem>>, vector<1x64x32xf32>
    %140 = vector.shape_cast %139 : vector<1x64x32xf32> to vector<64x32xf32>
    %cst_63 = arith.constant dense<0.000000e+00> : vector<16x32xf32>
    %141 = tpu.matmul %138, %140, %cst_63 {dimension_numbers = #tpu.dot_dimension_numbers<[1], [0], [0], [1], [0, 0, 1, 1], [], []>} : vector<16x64xf32>, vector<64x32xf32>, vector<16x32xf32> -> vector<16x32xf32>
    %c0_64 = arith.constant 0 : index
    %c0_65 = arith.constant 0 : index
    %c0_66 = arith.constant 0 : index
    %142 = vector.load %arg15[%c0_64, %c0_65, %c0_66] : memref<2x1x32xf32, #tpu.memory_space<vmem>>, vector<1x1x32xf32>
    %143 = vector.shape_cast %142 : vector<1x1x32xf32> to vector<1x32xf32>
    %144 = vector.broadcast %143 : vector<1x32xf32> to vector<16x32xf32>
    %145 = arith.addf %141, %144 : vector<16x32xf32>
    %146 = arith.addf %118, %145 : vector<16x32xf32>
    %c0_67 = arith.constant 0 : index
    %c0_68 = arith.constant 0 : index
    %c0_69 = arith.constant 0 : index
    %147 = vector.load %arg16[%c0_67, %c0_68, %c0_69] : memref<2x1x32xf32, #tpu.memory_space<vmem>>, vector<1x1x32xf32>
    %148 = vector.shape_cast %147 : vector<1x1x32xf32> to vector<1x32xf32>
    %c0_70 = arith.constant 0 : index
    %c0_71 = arith.constant 0 : index
    %c0_72 = arith.constant 0 : index
    %149 = vector.load %arg17[%c0_70, %c0_71, %c0_72] : memref<2x1x32xf32, #tpu.memory_space<vmem>>, vector<1x1x32xf32>
    %150 = vector.shape_cast %149 : vector<1x1x32xf32> to vector<1x32xf32>
    %cst_73 = arith.constant dense<0.000000e+00> : vector<16xf32>
    %151 = vector.multi_reduction <add>, %146, %cst_73 [1] : vector<16x32xf32> to vector<16xf32>
    %152 = vector.shape_cast %151 : vector<16xf32> to vector<16x1xf32>
    %cst_74 = arith.constant 3.200000e+01 : f32
    %153 = vector.broadcast %cst_74 : f32 to vector<16x1xf32>
    %154 = arith.divf %152, %153 : vector<16x1xf32>
    %155 = vector.broadcast %154 : vector<16x1xf32> to vector<16x32xf32>
    %156 = arith.subf %146, %155 : vector<16x32xf32>
    %157 = arith.mulf %156, %156 : vector<16x32xf32>
    %cst_75 = arith.constant dense<0.000000e+00> : vector<16xf32>
    %158 = vector.multi_reduction <add>, %157, %cst_75 [1] : vector<16x32xf32> to vector<16xf32>
    %159 = vector.shape_cast %158 : vector<16xf32> to vector<16x1xf32>
    %cst_76 = arith.constant 3.200000e+01 : f32
    %160 = vector.broadcast %cst_76 : f32 to vector<16x1xf32>
    %161 = arith.divf %159, %160 : vector<16x1xf32>
    %162 = vector.broadcast %154 : vector<16x1xf32> to vector<16x32xf32>
    %163 = arith.subf %146, %162 : vector<16x32xf32>
    %cst_77 = arith.constant 9.99999996E-13 : f32
    %164 = vector.broadcast %cst_77 : f32 to vector<16x1xf32>
    %165 = arith.addf %161, %164 : vector<16x1xf32>
    %166 = math.rsqrt %165 : vector<16x1xf32>
    %167 = vector.broadcast %166 : vector<16x1xf32> to vector<16x32xf32>
    %168 = arith.mulf %163, %167 : vector<16x32xf32>
    %169 = vector.broadcast %148 : vector<1x32xf32> to vector<16x32xf32>
    %170 = arith.mulf %168, %169 : vector<16x32xf32>
    %171 = vector.broadcast %150 : vector<1x32xf32> to vector<16x32xf32>
    %172 = arith.addf %170, %171 : vector<16x32xf32>
    %c1 = arith.constant 1 : index
    %c0_78 = arith.constant 0 : index
    %c0_79 = arith.constant 0 : index
    %173 = vector.load %arg6[%c1, %c0_78, %c0_79] : memref<2x32x96xf32, #tpu.memory_space<vmem>>, vector<1x32x96xf32>
    %174 = vector.shape_cast %173 : vector<1x32x96xf32> to vector<32x96xf32>
    %cst_80 = arith.constant dense<0.000000e+00> : vector<16x96xf32>
    %175 = tpu.matmul %172, %174, %cst_80 {dimension_numbers = #tpu.dot_dimension_numbers<[1], [0], [0], [1], [0, 0, 1, 1], [], []>} : vector<16x32xf32>, vector<32x96xf32>, vector<16x96xf32> -> vector<16x96xf32>
    %c1_81 = arith.constant 1 : index
    %c0_82 = arith.constant 0 : index
    %c0_83 = arith.constant 0 : index
    %176 = vector.load %arg7[%c1_81, %c0_82, %c0_83] : memref<2x1x96xf32, #tpu.memory_space<vmem>>, vector<1x1x96xf32>
    %177 = vector.shape_cast %176 : vector<1x1x96xf32> to vector<1x96xf32>
    %178 = vector.broadcast %177 : vector<1x96xf32> to vector<16x96xf32>
    %179 = arith.addf %175, %178 : vector<16x96xf32>
    %180 = vector.extract_strided_slice %179 {offsets = [0, 0], sizes = [16, 32], strides = [1, 1]} : vector<16x96xf32> to vector<16x32xf32>
    %181 = vector.shape_cast %180 : vector<16x32xf32> to vector<2x8x32xf32>
    %182 = vector.extract_strided_slice %179 {offsets = [0, 32], sizes = [16, 32], strides = [1, 1]} : vector<16x96xf32> to vector<16x32xf32>
    %183 = vector.shape_cast %182 : vector<16x32xf32> to vector<2x8x32xf32>
    %184 = vector.extract_strided_slice %179 {offsets = [0, 64], sizes = [16, 32], strides = [1, 1]} : vector<16x96xf32> to vector<16x32xf32>
    %185 = vector.shape_cast %184 : vector<16x32xf32> to vector<2x8x32xf32>
    %186 = vector.extract_strided_slice %181 {offsets = [0, 0, 0], sizes = [2, 8, 8], strides = [1, 1, 1]} : vector<2x8x32xf32> to vector<2x8x8xf32>
    %187 = vector.extract_strided_slice %181 {offsets = [0, 0, 8], sizes = [2, 8, 8], strides = [1, 1, 1]} : vector<2x8x32xf32> to vector<2x8x8xf32>
    %188 = vector.extract_strided_slice %181 {offsets = [0, 0, 16], sizes = [2, 8, 8], strides = [1, 1, 1]} : vector<2x8x32xf32> to vector<2x8x8xf32>
    %189 = vector.extract_strided_slice %181 {offsets = [0, 0, 24], sizes = [2, 8, 8], strides = [1, 1, 1]} : vector<2x8x32xf32> to vector<2x8x8xf32>
    %190 = tpu.concatenate %186, %187, %188, %189 in 0 : vector<2x8x8xf32>, vector<2x8x8xf32>, vector<2x8x8xf32>, vector<2x8x8xf32> -> vector<8x8x8xf32>
    %191 = vector.extract_strided_slice %183 {offsets = [0, 0, 0], sizes = [2, 8, 8], strides = [1, 1, 1]} : vector<2x8x32xf32> to vector<2x8x8xf32>
    %192 = vector.extract_strided_slice %183 {offsets = [0, 0, 8], sizes = [2, 8, 8], strides = [1, 1, 1]} : vector<2x8x32xf32> to vector<2x8x8xf32>
    %193 = vector.extract_strided_slice %183 {offsets = [0, 0, 16], sizes = [2, 8, 8], strides = [1, 1, 1]} : vector<2x8x32xf32> to vector<2x8x8xf32>
    %194 = vector.extract_strided_slice %183 {offsets = [0, 0, 24], sizes = [2, 8, 8], strides = [1, 1, 1]} : vector<2x8x32xf32> to vector<2x8x8xf32>
    %195 = tpu.concatenate %191, %192, %193, %194 in 0 : vector<2x8x8xf32>, vector<2x8x8xf32>, vector<2x8x8xf32>, vector<2x8x8xf32> -> vector<8x8x8xf32>
    %196 = vector.extract_strided_slice %185 {offsets = [0, 0, 0], sizes = [2, 8, 8], strides = [1, 1, 1]} : vector<2x8x32xf32> to vector<2x8x8xf32>
    %197 = vector.extract_strided_slice %185 {offsets = [0, 0, 8], sizes = [2, 8, 8], strides = [1, 1, 1]} : vector<2x8x32xf32> to vector<2x8x8xf32>
    %198 = vector.extract_strided_slice %185 {offsets = [0, 0, 16], sizes = [2, 8, 8], strides = [1, 1, 1]} : vector<2x8x32xf32> to vector<2x8x8xf32>
    %199 = vector.extract_strided_slice %185 {offsets = [0, 0, 24], sizes = [2, 8, 8], strides = [1, 1, 1]} : vector<2x8x32xf32> to vector<2x8x8xf32>
    %200 = tpu.concatenate %196, %197, %198, %199 in 0 : vector<2x8x8xf32>, vector<2x8x8xf32>, vector<2x8x8xf32>, vector<2x8x8xf32> -> vector<8x8x8xf32>
    "tpu.trace_start"() <{level = 10 : i32, message = "nqd,nkd->nqk"}> : () -> ()
    %cst_84 = arith.constant dense<0.000000e+00> : vector<8x8x8xf32>
    %201 = tpu.matmul %190, %195, %cst_84 {dimension_numbers = #tpu.dot_dimension_numbers<[2], [2], [1], [1], [0, 0, 0, 1, 1, 1], [0], [0]>} : vector<8x8x8xf32>, vector<8x8x8xf32>, vector<8x8x8xf32> -> vector<8x8x8xf32>
    "tpu.trace_stop"() : () -> ()
    %cst_85 = arith.constant 0.353553385 : f32
    %202 = vector.broadcast %cst_85 : f32 to vector<8x8x8xf32>
    %203 = arith.mulf %201, %202 : vector<8x8x8xf32>
    %204 = vector.broadcast %34 : vector<8x1x8xf32> to vector<8x8x8xf32>
    %205 = arith.addf %203, %204 : vector<8x8x8xf32>
    %cst_86 = arith.constant dense<0xFF800000> : vector<8x8xf32>
    %206 = vector.multi_reduction <maximumf>, %205, %cst_86 [2] : vector<8x8x8xf32> to vector<8x8xf32>
    %207 = vector.shape_cast %206 : vector<8x8xf32> to vector<8x8x1xf32>
    %208 = vector.broadcast %207 : vector<8x8x1xf32> to vector<8x8x8xf32>
    %209 = arith.subf %205, %208 : vector<8x8x8xf32>
    %210 = math.exp %209 : vector<8x8x8xf32>
    %cst_87 = arith.constant dense<0.000000e+00> : vector<8x8xf32>
    %211 = vector.multi_reduction <add>, %210, %cst_87 [2] : vector<8x8x8xf32> to vector<8x8xf32>
    %212 = vector.shape_cast %211 : vector<8x8xf32> to vector<8x8x1xf32>
    %213 = tpu.reciprocal %212 {approx = true} : vector<8x8x1xf32> -> vector<8x8x1xf32>
    %214 = vector.broadcast %213 : vector<8x8x1xf32> to vector<8x8x8xf32>
    %215 = arith.mulf %210, %214 : vector<8x8x8xf32>
    "tpu.trace_start"() <{level = 10 : i32, message = "nqk,nkd->nqd"}> : () -> ()
    %cst_88 = arith.constant dense<0.000000e+00> : vector<8x8x8xf32>
    %216 = tpu.matmul %215, %200, %cst_88 {dimension_numbers = #tpu.dot_dimension_numbers<[2], [1], [1], [2], [0, 0, 0, 1, 1, 2], [0], [0]>} : vector<8x8x8xf32>, vector<8x8x8xf32>, vector<8x8x8xf32> -> vector<8x8x8xf32>
    "tpu.trace_stop"() : () -> ()
    %217 = vector.extract_strided_slice %216 {offsets = [0, 0, 0], sizes = [2, 8, 8], strides = [1, 1, 1]} : vector<8x8x8xf32> to vector<2x8x8xf32>
    %218 = vector.extract_strided_slice %216 {offsets = [2, 0, 0], sizes = [2, 8, 8], strides = [1, 1, 1]} : vector<8x8x8xf32> to vector<2x8x8xf32>
    %219 = vector.extract_strided_slice %216 {offsets = [4, 0, 0], sizes = [2, 8, 8], strides = [1, 1, 1]} : vector<8x8x8xf32> to vector<2x8x8xf32>
    %220 = vector.extract_strided_slice %216 {offsets = [6, 0, 0], sizes = [2, 8, 8], strides = [1, 1, 1]} : vector<8x8x8xf32> to vector<2x8x8xf32>
    %221 = tpu.concatenate %217, %218, %219, %220 in 2 : vector<2x8x8xf32>, vector<2x8x8xf32>, vector<2x8x8xf32>, vector<2x8x8xf32> -> vector<2x8x32xf32>
    %222 = vector.shape_cast %221 : vector<2x8x32xf32> to vector<16x32xf32>
    %c1_89 = arith.constant 1 : index
    %c0_90 = arith.constant 0 : index
    %c0_91 = arith.constant 0 : index
    %223 = vector.load %arg8[%c1_89, %c0_90, %c0_91] : memref<2x32x32xf32, #tpu.memory_space<vmem>>, vector<1x32x32xf32>
    %224 = vector.shape_cast %223 : vector<1x32x32xf32> to vector<32x32xf32>
    %cst_92 = arith.constant dense<0.000000e+00> : vector<16x32xf32>
    %225 = tpu.matmul %222, %224, %cst_92 {dimension_numbers = #tpu.dot_dimension_numbers<[1], [0], [0], [1], [0, 0, 1, 1], [], []>} : vector<16x32xf32>, vector<32x32xf32>, vector<16x32xf32> -> vector<16x32xf32>
    %c1_93 = arith.constant 1 : index
    %c0_94 = arith.constant 0 : index
    %c0_95 = arith.constant 0 : index
    %226 = vector.load %arg9[%c1_93, %c0_94, %c0_95] : memref<2x1x32xf32, #tpu.memory_space<vmem>>, vector<1x1x32xf32>
    %227 = vector.shape_cast %226 : vector<1x1x32xf32> to vector<1x32xf32>
    %228 = vector.broadcast %227 : vector<1x32xf32> to vector<16x32xf32>
    %229 = arith.addf %225, %228 : vector<16x32xf32>
    %230 = arith.addf %172, %229 : vector<16x32xf32>
    %c1_96 = arith.constant 1 : index
    %c0_97 = arith.constant 0 : index
    %c0_98 = arith.constant 0 : index
    %231 = vector.load %arg10[%c1_96, %c0_97, %c0_98] : memref<2x1x32xf32, #tpu.memory_space<vmem>>, vector<1x1x32xf32>
    %232 = vector.shape_cast %231 : vector<1x1x32xf32> to vector<1x32xf32>
    %c1_99 = arith.constant 1 : index
    %c0_100 = arith.constant 0 : index
    %c0_101 = arith.constant 0 : index
    %233 = vector.load %arg11[%c1_99, %c0_100, %c0_101] : memref<2x1x32xf32, #tpu.memory_space<vmem>>, vector<1x1x32xf32>
    %234 = vector.shape_cast %233 : vector<1x1x32xf32> to vector<1x32xf32>
    %cst_102 = arith.constant dense<0.000000e+00> : vector<16xf32>
    %235 = vector.multi_reduction <add>, %230, %cst_102 [1] : vector<16x32xf32> to vector<16xf32>
    %236 = vector.shape_cast %235 : vector<16xf32> to vector<16x1xf32>
    %cst_103 = arith.constant 3.200000e+01 : f32
    %237 = vector.broadcast %cst_103 : f32 to vector<16x1xf32>
    %238 = arith.divf %236, %237 : vector<16x1xf32>
    %239 = vector.broadcast %238 : vector<16x1xf32> to vector<16x32xf32>
    %240 = arith.subf %230, %239 : vector<16x32xf32>
    %241 = arith.mulf %240, %240 : vector<16x32xf32>
    %cst_104 = arith.constant dense<0.000000e+00> : vector<16xf32>
    %242 = vector.multi_reduction <add>, %241, %cst_104 [1] : vector<16x32xf32> to vector<16xf32>
    %243 = vector.shape_cast %242 : vector<16xf32> to vector<16x1xf32>
    %cst_105 = arith.constant 3.200000e+01 : f32
    %244 = vector.broadcast %cst_105 : f32 to vector<16x1xf32>
    %245 = arith.divf %243, %244 : vector<16x1xf32>
    %246 = vector.broadcast %238 : vector<16x1xf32> to vector<16x32xf32>
    %247 = arith.subf %230, %246 : vector<16x32xf32>
    %cst_106 = arith.constant 9.99999996E-13 : f32
    %248 = vector.broadcast %cst_106 : f32 to vector<16x1xf32>
    %249 = arith.addf %245, %248 : vector<16x1xf32>
    %250 = math.rsqrt %249 : vector<16x1xf32>
    %251 = vector.broadcast %250 : vector<16x1xf32> to vector<16x32xf32>
    %252 = arith.mulf %247, %251 : vector<16x32xf32>
    %253 = vector.broadcast %232 : vector<1x32xf32> to vector<16x32xf32>
    %254 = arith.mulf %252, %253 : vector<16x32xf32>
    %255 = vector.broadcast %234 : vector<1x32xf32> to vector<16x32xf32>
    %256 = arith.addf %254, %255 : vector<16x32xf32>
    %c1_107 = arith.constant 1 : index
    %c0_108 = arith.constant 0 : index
    %c0_109 = arith.constant 0 : index
    %257 = vector.load %arg12[%c1_107, %c0_108, %c0_109] : memref<2x32x64xf32, #tpu.memory_space<vmem>>, vector<1x32x64xf32>
    %258 = vector.shape_cast %257 : vector<1x32x64xf32> to vector<32x64xf32>
    %cst_110 = arith.constant dense<0.000000e+00> : vector<16x64xf32>
    %259 = tpu.matmul %256, %258, %cst_110 {dimension_numbers = #tpu.dot_dimension_numbers<[1], [0], [0], [1], [0, 0, 1, 1], [], []>} : vector<16x32xf32>, vector<32x64xf32>, vector<16x64xf32> -> vector<16x64xf32>
    %c1_111 = arith.constant 1 : index
    %c0_112 = arith.constant 0 : index
    %c0_113 = arith.constant 0 : index
    %260 = vector.load %arg13[%c1_111, %c0_112, %c0_113] : memref<2x1x64xf32, #tpu.memory_space<vmem>>, vector<1x1x64xf32>
    %261 = vector.shape_cast %260 : vector<1x1x64xf32> to vector<1x64xf32>
    %262 = vector.broadcast %261 : vector<1x64xf32> to vector<16x64xf32>
    %263 = arith.addf %259, %262 : vector<16x64xf32>
    %264 = arith.mulf %263, %263 : vector<16x64xf32>
    %265 = arith.mulf %263, %264 : vector<16x64xf32>
    %cst_114 = arith.constant 4.471500e-02 : f32
    %266 = vector.broadcast %cst_114 : f32 to vector<16x64xf32>
    %267 = arith.mulf %266, %265 : vector<16x64xf32>
    %268 = arith.addf %263, %267 : vector<16x64xf32>
    %cst_115 = arith.constant 0.797884583 : f32
    %269 = vector.broadcast %cst_115 : f32 to vector<16x64xf32>
    %270 = arith.mulf %269, %268 : vector<16x64xf32>
    %271 = math.tanh %270 : vector<16x64xf32>
    %cst_116 = arith.constant 1.000000e+00 : f32
    %272 = vector.broadcast %cst_116 : f32 to vector<16x64xf32>
    %273 = arith.addf %272, %271 : vector<16x64xf32>
    %cst_117 = arith.constant 5.000000e-01 : f32
    %274 = vector.broadcast %cst_117 : f32 to vector<16x64xf32>
    %275 = arith.mulf %274, %273 : vector<16x64xf32>
    %276 = arith.mulf %263, %275 : vector<16x64xf32>
    %c1_118 = arith.constant 1 : index
    %c0_119 = arith.constant 0 : index
    %c0_120 = arith.constant 0 : index
    %277 = vector.load %arg14[%c1_118, %c0_119, %c0_120] : memref<2x64x32xf32, #tpu.memory_space<vmem>>, vector<1x64x32xf32>
    %278 = vector.shape_cast %277 : vector<1x64x32xf32> to vector<64x32xf32>
    %cst_121 = arith.constant dense<0.000000e+00> : vector<16x32xf32>
    %279 = tpu.matmul %276, %278, %cst_121 {dimension_numbers = #tpu.dot_dimension_numbers<[1], [0], [0], [1], [0, 0, 1, 1], [], []>} : vector<16x64xf32>, vector<64x32xf32>, vector<16x32xf32> -> vector<16x32xf32>
    %c1_122 = arith.constant 1 : index
    %c0_123 = arith.constant 0 : index
    %c0_124 = arith.constant 0 : index
    %280 = vector.load %arg15[%c1_122, %c0_123, %c0_124] : memref<2x1x32xf32, #tpu.memory_space<vmem>>, vector<1x1x32xf32>
    %281 = vector.shape_cast %280 : vector<1x1x32xf32> to vector<1x32xf32>
    %282 = vector.broadcast %281 : vector<1x32xf32> to vector<16x32xf32>
    %283 = arith.addf %279, %282 : vector<16x32xf32>
    %284 = arith.addf %256, %283 : vector<16x32xf32>
    %c1_125 = arith.constant 1 : index
    %c0_126 = arith.constant 0 : index
    %c0_127 = arith.constant 0 : index
    %285 = vector.load %arg16[%c1_125, %c0_126, %c0_127] : memref<2x1x32xf32, #tpu.memory_space<vmem>>, vector<1x1x32xf32>
    %286 = vector.shape_cast %285 : vector<1x1x32xf32> to vector<1x32xf32>
    %c1_128 = arith.constant 1 : index
    %c0_129 = arith.constant 0 : index
    %c0_130 = arith.constant 0 : index
    %287 = vector.load %arg17[%c1_128, %c0_129, %c0_130] : memref<2x1x32xf32, #tpu.memory_space<vmem>>, vector<1x1x32xf32>
    %288 = vector.shape_cast %287 : vector<1x1x32xf32> to vector<1x32xf32>
    %cst_131 = arith.constant dense<0.000000e+00> : vector<16xf32>
    %289 = vector.multi_reduction <add>, %284, %cst_131 [1] : vector<16x32xf32> to vector<16xf32>
    %290 = vector.shape_cast %289 : vector<16xf32> to vector<16x1xf32>
    %cst_132 = arith.constant 3.200000e+01 : f32
    %291 = vector.broadcast %cst_132 : f32 to vector<16x1xf32>
    %292 = arith.divf %290, %291 : vector<16x1xf32>
    %293 = vector.broadcast %292 : vector<16x1xf32> to vector<16x32xf32>
    %294 = arith.subf %284, %293 : vector<16x32xf32>
    %295 = arith.mulf %294, %294 : vector<16x32xf32>
    %cst_133 = arith.constant dense<0.000000e+00> : vector<16xf32>
    %296 = vector.multi_reduction <add>, %295, %cst_133 [1] : vector<16x32xf32> to vector<16xf32>
    %297 = vector.shape_cast %296 : vector<16xf32> to vector<16x1xf32>
    %cst_134 = arith.constant 3.200000e+01 : f32
    %298 = vector.broadcast %cst_134 : f32 to vector<16x1xf32>
    %299 = arith.divf %297, %298 : vector<16x1xf32>
    %300 = vector.broadcast %292 : vector<16x1xf32> to vector<16x32xf32>
    %301 = arith.subf %284, %300 : vector<16x32xf32>
    %cst_135 = arith.constant 9.99999996E-13 : f32
    %302 = vector.broadcast %cst_135 : f32 to vector<16x1xf32>
    %303 = arith.addf %299, %302 : vector<16x1xf32>
    %304 = math.rsqrt %303 : vector<16x1xf32>
    %305 = vector.broadcast %304 : vector<16x1xf32> to vector<16x32xf32>
    %306 = arith.mulf %301, %305 : vector<16x32xf32>
    %307 = vector.broadcast %286 : vector<1x32xf32> to vector<16x32xf32>
    %308 = arith.mulf %306, %307 : vector<16x32xf32>
    %309 = vector.broadcast %288 : vector<1x32xf32> to vector<16x32xf32>
    %310 = arith.addf %308, %309 : vector<16x32xf32>
    %311 = vector.shape_cast %310 : vector<16x32xf32> to vector<2x8x32xf32>
    %312 = vector.extract_strided_slice %311 {offsets = [0, 0, 0], sizes = [2, 1, 32], strides = [1, 1, 1]} : vector<2x8x32xf32> to vector<2x1x32xf32>
    %313 = vector.shape_cast %312 : vector<2x1x32xf32> to vector<2x32xf32>
    %c0_136 = arith.constant 0 : index
    %c0_137 = arith.constant 0 : index
    %314 = vector.load %arg18[%c0_136, %c0_137] : memref<32x32xf32, #tpu.memory_space<vmem>>, vector<32x32xf32>
    %cst_138 = arith.constant dense<0.000000e+00> : vector<2x32xf32>
    %315 = tpu.matmul %313, %314, %cst_138 {dimension_numbers = #tpu.dot_dimension_numbers<[1], [0], [0], [1], [0, 0, 1, 1], [], []>} : vector<2x32xf32>, vector<32x32xf32>, vector<2x32xf32> -> vector<2x32xf32>
    %c0_139 = arith.constant 0 : index
    %c0_140 = arith.constant 0 : index
    %316 = vector.load %arg19[%c0_139, %c0_140] : memref<1x32xf32, #tpu.memory_space<vmem>>, vector<1x32xf32>
    %317 = vector.broadcast %316 : vector<1x32xf32> to vector<2x32xf32>
    %318 = arith.addf %315, %317 : vector<2x32xf32>
    %319 = math.tanh %318 : vector<2x32xf32>
    %c0_141 = arith.constant 0 : index
    %c0_142 = arith.constant 0 : index
    %320 = vector.load %arg20[%c0_141, %c0_142] : memref<32x3xf32, #tpu.memory_space<vmem>>, vector<32x3xf32>
    %cst_143 = arith.constant dense<0.000000e+00> : vector<2x3xf32>
    %321 = tpu.matmul %319, %320, %cst_143 {dimension_numbers = #tpu.dot_dimension_numbers<[1], [0], [0], [1], [0, 0, 1, 1], [], []>} : vector<2x32xf32>, vector<32x3xf32>, vector<2x3xf32> -> vector<2x3xf32>
    %c0_144 = arith.constant 0 : index
    %c0_145 = arith.constant 0 : index
    %322 = vector.load %arg21[%c0_144, %c0_145] : memref<1x3xf32, #tpu.memory_space<vmem>>, vector<1x3xf32>
    %323 = vector.broadcast %322 : vector<1x3xf32> to vector<2x3xf32>
    %324 = arith.addf %321, %323 : vector<2x3xf32>
    %c0_146 = arith.constant 0 : index
    %c0_147 = arith.constant 0 : index
    %325 = vector.load %arg23[%c0_146, %c0_147] : memref<2x3xf32, #tpu.memory_space<vmem>>, vector<2x3xf32>
    tpu.vector_store %arg23[%c0_146, %c0_147], %324 {strides = array<i32>} : memref<2x3xf32, #tpu.memory_space<vmem>>, vector<2x3xf32>,
    %cst_148 = arith.constant dense<0xFF800000> : vector<2xf32>
    %326 = vector.multi_reduction <maximumf>, %324, %cst_148 [1] : vector<2x3xf32> to vector<2xf32>
    %327 = vector.shape_cast %326 : vector<2xf32> to vector<2x1xf32>
    %328 = vector.broadcast %327 : vector<2x1xf32> to vector<2x3xf32>
    %329 = arith.subf %324, %328 : vector<2x3xf32>
    %330 = math.exp %329 : vector<2x3xf32>
    %cst_149 = arith.constant dense<0.000000e+00> : vector<2xf32>
    %331 = vector.multi_reduction <add>, %330, %cst_149 [1] : vector<2x3xf32> to vector<2xf32>
    %332 = vector.shape_cast %331 : vector<2xf32> to vector<2x1xf32>
    %333 = math.log %332 : vector<2x1xf32>
    %334 = arith.addf %333, %327 : vector<2x1xf32>
    %335 = vector.broadcast %334 : vector<2x1xf32> to vector<2x3xf32>
    %336 = arith.subf %324, %335 : vector<2x3xf32>
    %c0_150 = arith.constant 0 : index
    %c0_151 = arith.constant 0 : index
    %337 = vector.load %arg22[%c0_150, %c0_151] : memref<2x1xi32, #tpu.memory_space<vmem>>, vector<2x1xi32>
    %338 = tpu.iota {dimensions = array<i32: 1>} : vector<2x3xi32>
    %339 = vector.broadcast %337 : vector<2x1xi32> to vector<2x3xi32>
    %340 = arith.cmpi eq, %338, %339 : vector<2x3xi32>
    %341 = arith.extui %340 : vector<2x3xi1> to vector<2x3xi32>
    %342 = arith.sitofp %341 : vector<2x3xi32> to vector<2x3xf32>
    %343 = arith.mulf %342, %336 : vector<2x3xf32>
    %344 = vector.shape_cast %343 : vector<2x3xf32> to vector<1x2x3xf32>
    %cst_152 = arith.constant dense<0.000000e+00> : vector<1xf32>
    %345 = vector.multi_reduction <add>, %344, %cst_152 [1, 2] : vector<1x2x3xf32> to vector<1xf32>
    %346 = vector.shape_cast %345 : vector<1xf32> to vector<1x1x1xf32>
    %347 = vector.extract %346[0, 0, 0] : f32 from vector<1x1x1xf32>
    %cst_153 = arith.constant 0.000000e+00 : f32
    %348 = arith.subf %cst_153, %347 : f32
    %cst_154 = arith.constant 2.000000e+00 : f32
    %349 = arith.divf %348, %cst_154 : f32
    %350 = vector.broadcast %349 : f32 to vector<1x1xf32>
    %c0_155 = arith.constant 0 : index
    %c0_156 = arith.constant 0 : index
    %351 = vector.load %arg24[%c0_155, %c0_156] : memref<1x1xf32, #tpu.memory_space<vmem>>, vector<1x1xf32>
    tpu.vector_store %arg24[%c0_155, %c0_156], %350 {strides = array<i32>} : memref<1x1xf32, #tpu.memory_space<vmem>>, vector<1x1xf32>,
    return
  }
}

</mosaic_0001>

<bundles_post_ra>
// kernel: sentiment_classifier_forward.1
= control target key start
LH: loop header
LB: loop body
LE: loop exit
PB: predicated region body
PF: predicated region fallthrough
CT: control target
= control target key end

     0   :  { %s3145_s0 = inlined_call_operand.vmem [shape: f32[2,8,32], index: 0, kind: input, shape index: {}]   ;;  %s3146_s1 = inlined_call_operand.vmem [shape: f32[1,8,32], index: 1, kind: input, shape index: {}]   ;;  %s3147_s2 = inlined_call_operand.vmem [shape: f32[1,1,32], index: 2, kind: input, shape index: {}]   ;;  %s3148_s3 = inlined_call_operand.vmem [shape: f32[8,1,8], index: 3, kind: input, shape index: {}]   ;;  %s3149_s4 = inlined_call_operand.vmem [shape: f32[1,32], index: 4, kind: input, shape index: {}]   ;;  %s3150_s5 = inlined_call_operand.vmem [shape: f32[1,32], index: 5, kind: input, shape index: {}]   ;;  %s3151_s6 = inlined_call_operand.vmem [shape: f32[2,32,96], index: 6, kind: input, shape index: {}]   ;;  %s3152_s7 = inlined_call_operand.vmem [shape: f32[2,1,96], index: 7, kind: input, shape index: {}]   ;;  %s3153_s8 = inlined_call_operand.vmem [shape: f32[2,32,32], index: 8, kind: input, shape index: {}]   ;;  %s3154_s9 = inlined_call_operand.vmem [shape: f32[2,1,32], index: 9, kind: input, shape index: {}]   ;;  %s3155_s10 = inlined_call_operand.vmem [shape: f32[2,1,32], index: 10, kind: input, shape index: {}]   ;;  %s3156_s11 = inlined_call_operand.vmem [shape: f32[2,1,32], index: 11, kind: input, shape index: {}]   ;;  %s3157_s12 = inlined_call_operand.vmem [shape: f32[2,32,64], index: 12, kind: input, shape index: {}]   ;;  %s3158_s13 = inlined_call_operand.vmem [shape: f32[2,1,64], index: 13, kind: input, shape index: {}]   ;;  %s3159_s14 = inlined_call_operand.vmem [shape: f32[2,64,32], index: 14, kind: input, shape index: {}]   ;;  %s3160_s15 = inlined_call_operand.vmem [shape: f32[2,1,32], index: 15, kind: input, shape index: {}]   ;;  %s3161_s16 = inlined_call_operand.vmem [shape: f32[2,1,32], index: 16, kind: input, shape index: {}]   ;;  %s3162_s17 = inlined_call_operand.vmem [shape: f32[2,1,32], index: 17, kind: input, shape index: {}]   ;;  %s3163_s18 = inlined_call_operand.vmem [shape: f32[32,32], index: 18, kind: input, shape index: {}]   ;;  %s3164_s19 = inlined_call_operand.vmem [shape: f32[1,32], index: 19, kind: input, shape index: {}]   ;;  %s3165_s20 = inlined_call_operand.vmem [shape: f32[32,3], index: 20, kind: input, shape index: {}]   ;;  %s3166_s21 = inlined_call_operand.vmem [shape: f32[1,3], index: 21, kind: input, shape index: {}]   ;;  %s3167_s22 = inlined_call_operand.vmem [shape: s32[2,1], index: 22, kind: input, shape index: {}]   ;;  %s3168_s23 = inlined_call_operand.hbm [shape: f32[2,3], index: 23, kind: output, shape index: {0}]   ;;  %s3169_s24 = inlined_call_operand.hbm [shape: f32[1,1], index: 24, kind: output, shape index: {1}]  }
   0x1   :  { %3187 = sst [smem:[#allocation8_spill]] %s3145_s0 }
   0x2   :  { %3188 = sst [smem:[#allocation9_spill]] %s3146_s1 }
   0x3   :  { %3189 = sst [smem:[#allocation10_spill]] %s3147_s2 }
   0x4   :  { %3190 = sst [smem:[#allocation11_spill]] %s3148_s3 }
   0x5   :  { %3191 = sst [smem:[#allocation12_spill]] %s3149_s4 }
   0x6   :  { %3192 = sst [smem:[#allocation13_spill]] %s3150_s5 }
   0x7   :  { %3193 = sst [smem:[#allocation14_spill]] %s3151_s6 }
   0x8   :  { %3194 = sst [smem:[#allocation15_spill]] %s3152_s7 }
   0x9   :  { %3195 = sst [smem:[#allocation16_spill]] %s3153_s8 }
   0xa   :  { %30 = vsyncpa [#allocation3], 0  ;;  %s3196_s27 = sld [smem:[#allocation8_spill]]  ;;  %vm91_vm0 = vcmask 261120  }
   0xb   :  { %s3197_s2 = sld [smem:[#allocation9_spill]] }
   0xc   :  { %s3198_s7 = sld [smem:[#allocation10_spill]] }
  0x10   :  { %v78_v0 = vld [vmem:[%s3196_s27] sm:$0xff]  ;;  %v79_v4 = vld [vmem:[%s3196_s27 + $0x8] sm:$0xff] }
  0x11   :  { %v80_v1 = vld [vmem:[%s3197_s2] sm:$0xff] }
  0x12   :  { %v81_v2 = vadd.f32 %v80_v1, %v78_v0  ;;  %v2192_v3 = vld [vmem:[%s3198_s7] ss:$0 sm:$0xff]  ;;  %v82_v5 = vadd.f32 %v80_v1, %v79_v4 }
  0x14   :  { %v87_v6 = vadd.f32 %v2192_v3, %v81_v2  ;;  %v88_v8 = vadd.f32 %v2192_v3, %v82_v5 }
  0x16   :  { %v92_v7 = vsel %vm91_vm0, %v87_v6, 0.0  ;;  %v95_v9 = vsel %vm91_vm0, %v88_v8, 0.0 }
  0x17   :  { %93 = vadd.xlane.f32.xlu0 %v92_v7 }
  0x18   :  { %31 = vsyncpa [#allocation5], 0  ;;  %v2375_v10 = vmov 32.0   ;;  %s3199_s4 = sld [smem:[#allocation14_spill]]  ;;  %s2376_s5 = smov 120   ;;  %vm214_vm8 = vcmask 64512  }
  0x19   :  { %2221 = vrcp.f32 %v2375_v10  ;;  %s3200_s0 = sld [smem:[#allocation12_spill]]  ;;  %s3181_s26 = smov 112   ;;  %vm783_vm9 = vcmask 130048   ;;  %vm786_vm10 = vcmask 195584  }
  0x1a   :  { %s3201_s3 = sld [smem:[#allocation13_spill]]  ;;  %s2378_s27 = smov 104  }
  0x1b   :  { %s3202_s1 = sld [smem:[#allocation15_spill]]  ;;  %s3177_s28 = smov 96  }
  0x1c   :  { %s3203_s29 = sld [smem:[#allocation11_spill]]  ;;  %s3175_s6 = smov 64  }
  0x1d   :  { %s3183_s2 = smov 24  }
  0x1e   :  { %v164_v27 = vld [vmem:[%s3199_s4 + $0x18] sm:$0xff]  ;;  %v163_v28 = vld [vmem:[%s3199_s4 + $0x10] sm:$0xff]  ;;  %v162_v29 = vld [vmem:[%s3199_s4 + $0x8] sm:$0xff] }
  0x1f   :  { %96 = vadd.xlane.f32.xlu0 %v95_v9  ;;  %v2222_v11 = vpop.eup %2221  ;;  %187 = vmatpush.msra.mxu0 %v164_v27  ;;  %v161_v30 = vld [vmem:[%s3199_s4] sm:$0xff] }
  0x20   :  { %v99_v12 = vmul.f32 32.0, %v2222_v11  ;;  %vm103_vm1 = vweird.f32 %v2222_v11  ;;  %v2193_v45 = vld [vmem:[%s3200_s0] ss:$0 sm:$0xff]  ;;  %s3179_s0 = smov 16  }
  0x21   :  { %188 = vmatpush.msra.mxu0 %v163_v28  ;;  %v2194_v49 = vld [vmem:[%s3201_s3] ss:$0 sm:$0xff]  ;;  %s3204_s3 = sld [smem:[#allocation16_spill]] }
  0x22   :  { %v100_v13 = vsub.f32 1.0, %v99_v12  ;;  %v2195_v59 = vld [vmem:[%s3202_s1] ss:$0 sm:$0xff] }
  0x23   :  { %189 = vmatpush.msra.mxu0 %v162_v29 }
  0x24   :  { %v101_v14 = vmul.f32 %v2222_v11, %v100_v13 }
  0x25   :  { %190 = vmatpush.msra.mxu0 %v161_v30  ;;  %v2657_v30 = vld [vmem:[%s3203_s29 + $0x2] ss:$0 sm:$0xff] }
  0x26   :  { %v102_v15 = vadd.f32 %v2222_v11, %v101_v14  ;;  %v2636_v14 = vld [vmem:[%s3203_s29] ss:$0 sm:$0xff] }
  0x28   :  { %v2528_v16 = vsel %vm103_vm1, %v2222_v11, %v102_v15 }
  0x8a   :  { %v94_v17 = vpop.xlane.xlu0 %93 }
  0x8b   :  { %v105_v18 = vmul.f32 %v2528_v16, %v94_v17 }
  0x8d   :  { %v107_v19 = vsub.f32 %v87_v6, %v105_v18 }
  0x8f   :  { %v109_v20 = vmul.f32 %v107_v19, %v107_v19 }
  0x91   :  { %v111_v21 = vsel %vm91_vm0, %v109_v20, 0.0  ;;  %v2643_v20 = vld [vmem:[%s3203_s29 + $0x4] ss:$0 sm:$0xff] }
  0x92   :  { %112 = vadd.xlane.f32.xlu1 %v111_v21  ;;  %v97_v22 = vpop.xlane.xlu0 %96 }
  0x93   :  { %v106_v23 = vmul.f32 %v2528_v16, %v97_v22 }
  0x95   :  { %v108_v24 = vsub.f32 %v88_v8, %v106_v23  ;;  %v2648_v23 = vld [vmem:[%s3203_s29 + $0x1] ss:$0 sm:$0xff] }
  0x97   :  { %v110_v25 = vmul.f32 %v108_v24, %v108_v24 }
  0x99   :  { %v114_v26 = vsel %vm91_vm0, %v110_v25, 0.0 }
  0x9a   :  { %115 = vadd.xlane.f32.xlu1 %v114_v26 }
 0x105   :  { %v113_v31 = vpop.xlane.xlu1 %112 }
 0x106   :  { %v117_v32 = vmul.f32 %v113_v31, %v2528_v16 }
 0x108   :  { %v119_v33 = vadd.f32 1e-12, %v117_v32 }
 0x10a   :  { %2223 = vrsqrt.f32 %v119_v33  ;;  %vm127_vm3 = vweird.f32 %v119_v33 }
 0x10d   :  { %v116_v34 = vpop.xlane.xlu1 %115 }
 0x10e   :  { %v118_v35 = vmul.f32 %v116_v34, %v2528_v16 }
 0x110   :  { %v2224_v36 = vpop.eup %2223  ;;  %v120_v37 = vadd.f32 1e-12, %v118_v35  ;;  %v2664_v35 = vld [vmem:[%s3203_s29 + $0x3] ss:$0 sm:$0xff] }
 0x111   :  { %v122_v38 = vmul.f32 %v2224_v36, %v119_v33  ;;  %vm128_vm2 = vweird.f32 %v2224_v36 }
 0x112   :  { %2225 = vrsqrt.f32 %v120_v37  ;;  %vm129_vm4 = vmor %vm127_vm3, %vm128_vm2  ;;  %vm137_vm5 = vweird.f32 %v120_v37  ;;  %vm951_vm2 = vcmask 523264  }
 0x113   :  { %v123_v39 = vmul.f32 %v2224_v36, %v122_v38 }
 0x115   :  { %v124_v40 = vmul.f32 0.5, %v123_v39 }
 0x117   :  { %v125_v41 = vsub.f32 1.5, %v124_v40 }
 0x118   :  { %v2226_v42 = vpop.eup %2225 }
 0x119   :  { %v126_v43 = vmul.f32 %v2224_v36, %v125_v41  ;;  %v132_v44 = vmul.f32 %v2226_v42, %v120_v37  ;;  %vm138_vm6 = vweird.f32 %v2226_v42 }
 0x11a   :  { %vm139_vm7 = vmor %vm137_vm5, %vm138_vm6 }
 0x11b   :  { %v130_v46 = vsel %vm129_vm4, %v2224_v36, %v126_v43  ;;  %v133_v47 = vmul.f32 %v2226_v42, %v132_v44 }
 0x11c   :  { %v141_v48 = vmul.f32 %v130_v46, %v107_v19 }
 0x11d   :  { %v134_v50 = vmul.f32 0.5, %v133_v47  ;;  %v2677_v47 = vld [vmem:[%s3203_s29 + $0x5] ss:$0 sm:$0xff] }
 0x11e   :  { %v146_v51 = vmul.f32 %v2193_v45, %v141_v48 }
 0x11f   :  { %v135_v52 = vsub.f32 1.5, %v134_v50 }
 0x120   :  { %v2554_v53 = vadd.f32 %v2194_v49, %v146_v51 }
 0x121   :  { %v136_v54 = vmul.f32 %v2226_v42, %v135_v52 }
 0x122   :  { %2048 = vmatmul.msk.f32.vlgmr.msra.gmra.mxu0 %vm91_vm0, %v2554_v53 }
 0x123   :  { %v140_v55 = vsel %vm139_vm7, %v2226_v42, %v136_v54  ;;  %v2671_v42 = vld [vmem:[%s3203_s29 + $0x7] ss:$0 sm:$0xff] }
 0x124   :  { %v142_v56 = vmul.f32 %v140_v55, %v108_v24 }
 0x126   :  { %v147_v57 = vmul.f32 %v2193_v45, %v142_v56 }
 0x128   :  { %v2558_v58 = vadd.f32 %v2194_v49, %v147_v57  ;;  %v2688_v57 = vld [vmem:[%s3203_s29 + $0x6] ss:$0 sm:$0xff]  ;;  %s3185_s29 = smov 8  }
 0x12a   :  { %2049 = vmatmul.msk.f32.gmra.mxu0 %vm91_vm0, %v2558_v58 }
 0x19f   :  { %v192_v60 = vpop.f32.mrf.mxu0 }
 0x1a0   :  { %v2565_v61 = vadd.f32 %v2195_v59, %v192_v60 }
 0x1a2   :  { %200 = vrot.lane.b32.xlu2 %v2565_v61, %s2376_s5 }
 0x1a7   :  { %v195_v62 = vpop.f32.mrf.mxu0 }
 0x1a8   :  { %v2569_v63 = vadd.f32 %v2195_v59, %v195_v62 }
 0x1aa   :  { %204 = vrot.lane.b32.xlu2 %v2565_v61, %s3181_s26  ;;  %210 = vrot.lane.b32.xlu1 %v2569_v63, %s2378_s27 }
 0x1ab   :  { %202 = vrot.lane.b32.xlu0 %v2569_v63, %s2376_s5 }
 0x1b2   :  { %208 = vrot.lane.b32.xlu2 %v2565_v61, %s2378_s27 }
 0x1ba   :  { %206 = vrot.lane.b32.xlu2 %v2569_v63, %s3181_s26  ;;  %s2034_s26 = sshll.u32 %s3169_s24, 4  ;;  %s2035_s26 = int_to_ptr.hbm [resolvable:$true] %s2034_s26 }
 0x1c2   :  { %212 = vrot.lane.b32.xlu2 %v2565_v61, %s3177_s28 }
 0x1fc   :  { %v2583_v0 = vpop.permute.xlu2 %200 }
 0x1fd   :  { %265 = vrot.lane.b32.xlu0 %v2583_v0, %s3177_s28 }
 0x204   :  { %v2587_v1 = vpop.permute.xlu2 %204 }
 0x205   :  { %317 = vrot.lane.b32.xlu2 %v2587_v1, %s3177_s28 }
 0x20c   :  { %v2591_v2 = vpop.permute.xlu2 %208 }
 0x20d   :  { %239 = vrot.lane.b32.xlu2 %v2569_v63, %s3177_s28 }
 0x214   :  { %v2595_v3 = vpop.permute.xlu2 %206 }
 0x21c   :  { %v213_v4 = vpop.permute.xlu2 %212  ;;  %v2597_v5 = vpop.permute.xlu1 %210 }
 0x21d   :  { %v2599_v6 = vpop.permute.xlu0 %202  ;;  %2050 = vmatpush.xpose.msk.msra.mxu1 %vm214_vm8, %v213_v4  ;;  %395 = vrot.lane.b32.xlu0 %v2597_v5, %s3177_s28  ;;  %v2161_v4 = vpack.i.bf16 %v2583_v0, %v2565_v61 }
 0x21e   :  { %291 = vrot.lane.b32.xlu1 %v2599_v6, %s3177_s28 }
 0x220   :  { %2051 = vmatmul.msk.f32.vlgmr.msra.gmra.mxu1 %vm214_vm8, %v2565_v61 }
 0x225   :  { %343 = vrot.lane.b32.xlu0 %v2595_v3, %s3177_s28 }
 0x226   :  { %369 = vrot.lane.b32.xlu1 %v2591_v2, %s3177_s28  ;;  %s3205_s28 = smov 112  }
 0x25f   :  { %v318_v7 = vpop.permute.xlu2 %317 }
 0x260   :  { %2058 = vmatpush.xpose.msk.msra.mxu2 %vm214_vm8, %v318_v7 }
 0x263   :  { %2059 = vmatmul.msk.f32.vlgmr.msra.gmra.mxu2 %vm214_vm8, %v2587_v1 }
 0x267   :  { %v240_v8 = vpop.permute.xlu2 %239 }
 0x268   :  { %2052 = vmatpush.xpose.msk.msrb.mxu0 %vm214_vm8, %v240_v8 }
 0x26b   :  { %2053 = vmatmul.msk.f32.vlgmr.msrb.gmra.mxu0 %vm214_vm8, %v2569_v63 }
 0x26f   :  { %v266_v9 = vpop.permute.xlu0 %265 }
 0x270   :  { %2054 = vmatpush.xpose.msk.msra.mxu3 %vm214_vm8, %v266_v9 }
 0x273   :  { %2055 = vmatmul.msk.f32.vlgmr.msra.gmra.mxu3 %vm214_vm8, %v2583_v0 }
 0x28f   :  { %v396_v10 = vpop.permute.xlu0 %395 }
 0x290   :  { %v292_v11 = vpop.permute.xlu1 %291  ;;  %2064 = vmatpush.xpose.msk.msrb.mxu2 %vm214_vm8, %v396_v10 }
 0x291   :  { %2056 = vmatpush.xpose.msk.msrb.mxu1 %vm214_vm8, %v292_v11 }
 0x293   :  { %2065 = vmatmul.msk.f32.vlgmr.msrb.gmra.mxu2 %vm214_vm8, %v2597_v5 }
 0x294   :  { %2057 = vmatmul.msk.f32.vlgmr.msrb.gmra.mxu1 %vm214_vm8, %v2599_v6 }
 0x297   :  { %v344_v12 = vpop.permute.xlu0 %343 }
 0x298   :  { %v370_v13 = vpop.permute.xlu1 %369  ;;  %2060 = vmatpush.xpose.msk.msrb.mxu3 %vm214_vm8, %v344_v12 }
 0x299   :  { %2062 = vmatpush.xpose.msk.msra.mxu1 %vm214_vm8, %v370_v13 }
 0x29b   :  { %2061 = vmatmul.msk.f32.vlgmr.msrb.gmra.mxu3 %vm214_vm8, %v2595_v3 }
 0x29c   :  { %2063 = vmatmul.msk.f32.vlgmr.msra.gmra.mxu1 %vm214_vm8, %v2591_v2 }
 0x29d   :  { %v236_v15 = vpop.f32.mrf.mxu1 }
 0x29e   :  { %v421_v17 = vmul.f32 0.35355338, %v236_v15 }
 0x2a0   :  { %v453_v18 = vadd.f32 %v2636_v14, %v421_v17 }
 0x2a2   :  { %v461_v19 = vsel %vm214_vm8, %v453_v18, -inf }
 0x2a3   :  { %462 = vmax.xlane.f32.xlu2 %v461_v19 }
 0x2e6   :  { %v340_v21 = vpop.f32.mrf.mxu2 }
 0x2e7   :  { %v425_v22 = vmul.f32 0.35355338, %v340_v21 }
 0x2e8   :  { %v262_v24 = vpop.f32.mrf.mxu0 }
 0x2e9   :  { %v422_v25 = vmul.f32 0.35355338, %v262_v24  ;;  %v457_v26 = vadd.f32 %v2643_v20, %v425_v22 }
 0x2eb   :  { %v473_v27 = vsel %vm214_vm8, %v457_v26, -inf  ;;  %v454_v28 = vadd.f32 %v2648_v23, %v422_v25 }
 0x2ec   :  { %474 = vmax.xlane.f32.xlu0 %v473_v27  ;;  %v2171_v27 = vpack.i.bf16 %v2591_v2, %v2569_v63 }
 0x2ed   :  { %v464_v29 = vsel %vm214_vm8, %v454_v28, -inf }
 0x2ee   :  { %465 = vmax.xlane.f32.xlu1 %v464_v29 }
 0x2f6   :  { %v288_v31 = vpop.f32.mrf.mxu3 }
 0x2f7   :  { %v423_v32 = vmul.f32 0.35355338, %v288_v31 }
 0x2f9   :  { %v455_v33 = vadd.f32 %v2657_v30, %v423_v32 }
 0x2fb   :  { %v467_v34 = vsel %vm214_vm8, %v455_v33, -inf }
 0x2fc   :  { %468 = vmax.xlane.f32.xlu1 %v467_v34 }
 0x311   :  { %v314_v36 = vpop.f32.mrf.mxu1 }
 0x312   :  { %v424_v37 = vmul.f32 0.35355338, %v314_v36 }
 0x314   :  { %v456_v38 = vadd.f32 %v2664_v35, %v424_v37 }
 0x316   :  { %v463_v39 = vpop.xlane.xlu2 %462  ;;  %v470_v40 = vsel %vm214_vm8, %v456_v38, -inf  ;;  %v418_v41 = vpop.f32.mrf.mxu2 }
 0x317   :  { %v485_v43 = vsub.f32 %v453_v18, %v463_v39  ;;  %471 = vmax.xlane.f32.xlu2 %v470_v40  ;;  %v428_v44 = vmul.f32 0.35355338, %v418_v41 }
 0x319   :  { %v493_v45 = vmul.f32 1.442695, %v485_v43  ;;  %v460_v46 = vadd.f32 %v2671_v42, %v428_v44  ;;  %v392_v50 = vpop.f32.mrf.mxu1 }
 0x31a   :  { %v427_v55 = vmul.f32 0.35355338, %v392_v50 }
 0x31b   :  { %2227 = vpow2.f32 %v493_v45  ;;  %v482_v48 = vsel %vm214_vm8, %v460_v46, -inf }
 0x31c   :  { %v459_v60 = vadd.f32 %v2688_v57, %v427_v55 }
 0x31e   :  { %v366_v49 = vpop.f32.mrf.mxu3  ;;  %v479_v62 = vsel %vm214_vm8, %v459_v60, -inf }
 0x31f   :  { %483 = vmax.xlane.f32.xlu2 %v482_v48  ;;  %v426_v51 = vmul.f32 0.35355338, %v366_v49 }
 0x321   :  { %v2680_v52 = vpop.eup %2227  ;;  %v458_v54 = vadd.f32 %v2677_v47, %v426_v51 }
 0x322   :  { %v509_v56 = vsel %vm214_vm8, %v2680_v52, 0.0 }
 0x323   :  { %510 = vadd.xlane.f32.xlu0 %v509_v56  ;;  %v476_v59 = vsel %vm214_vm8, %v458_v54, -inf }
 0x324   :  { %477 = vmax.xlane.f32.xlu1 %v476_v59 }
 0x32b   :  { %480 = vmax.xlane.f32.xlu0 %v479_v62 }
 0x337   :  { %2162 = vrot.lane.b32.xlu2 %v2161_v4, %s3175_s6 }
 0x35f   :  { %v475_v7 = vpop.xlane.xlu0 %474 }
 0x360   :  { %v489_v10 = vsub.f32 %v457_v26, %v475_v7 }
 0x361   :  { %v466_v8 = vpop.xlane.xlu1 %465 }
 0x362   :  { %v486_v9 = vsub.f32 %v454_v28, %v466_v8  ;;  %v501_v12 = vmul.f32 1.442695, %v489_v10 }
 0x364   :  { %v495_v11 = vmul.f32 1.442695, %v486_v9 }
 0x366   :  { %2229 = vpow2.f32 %v495_v11 }
 0x367   :  { %2231 = vpow2.f32 %v501_v12 }
 0x36c   :  { %v2696_v13 = vpop.eup %2229 }
 0x36d   :  { %v512_v15 = vsel %vm214_vm8, %v2696_v13, 0.0  ;;  %v2700_v61 = vpop.eup %2231 }
 0x36e   :  { %513 = vadd.xlane.f32.xlu1 %v512_v15  ;;  %v521_v19 = vsel %vm214_vm8, %v2700_v61, 0.0 }
 0x36f   :  { %v469_v17 = vpop.xlane.xlu1 %468 }
 0x370   :  { %v487_v18 = vsub.f32 %v455_v33, %v469_v17 }
 0x372   :  { %v497_v0 = vmul.f32 1.442695, %v487_v18 }
 0x374   :  { %2233 = vpow2.f32 %v497_v0 }
 0x376   :  { %522 = vadd.xlane.f32.xlu1 %v521_v19 }
 0x37a   :  { %v2234_v21 = vpop.eup %2233 }
 0x37b   :  { %v515_v22 = vsel %vm214_vm8, %v2234_v21, 0.0 }
 0x37c   :  { %516 = vadd.xlane.f32.xlu2 %v515_v22 }
 0x38a   :  { %v472_v24 = vpop.xlane.xlu2 %471 }
 0x38b   :  { %v488_v25 = vsub.f32 %v456_v38, %v472_v24 }
 0x38d   :  { %v499_v26 = vmul.f32 1.442695, %v488_v25 }
 0x38f   :  { %2235 = vpow2.f32 %v499_v26 }
 0x392   :  { %v484_v28 = vpop.xlane.xlu2 %483 }
 0x393   :  { %v492_v29 = vsub.f32 %v460_v46, %v484_v28 }
 0x394   :  { %2172 = vrot.lane.b32.xlu2 %v2171_v27, %s3175_s6 }
 0x395   :  { %v2708_v31 = vpop.eup %2235  ;;  %v507_v32 = vmul.f32 1.442695, %v492_v29 }
 0x396   :  { %v518_v33 = vsel %vm214_vm8, %v2708_v31, 0.0  ;;  %v511_v34 = vpop.xlane.xlu0 %510 }
 0x397   :  { %2237 = vpow2.f32 %v507_v32  ;;  %519 = vadd.xlane.f32.xlu0 %v518_v33  ;;  %v478_v36 = vpop.xlane.xlu1 %477 }
 0x398   :  { %2239 = vrcp.f32 %v511_v34  ;;  %v490_v37 = vsub.f32 %v458_v54, %v478_v36  ;;  %v2166_v54 = vpack.i.bf16 %v2599_v6, %v2587_v1 }
 0x39a   :  { %v503_v38 = vmul.f32 1.442695, %v490_v37  ;;  %v2163_v39 = vpop.permute.xlu2 %2162 }
 0x39b   :  { %v2165_v40 = vunpack.i.h.bf16 %v2163_v39  ;;  %v2164_v63 = vunpack.i.l.bf16 %v2163_v39  ;;  %v791_v39 = vld [vmem:[%s3204_s3 + $0x10] sm:$0xff] }
 0x39c   :  { %679 = vrot.lane.b32.xlu2 %v2595_v3, %s3175_s6  ;;  %2241 = vpow2.f32 %v503_v38  ;;  %v792_v38 = vld [vmem:[%s3204_s3 + $0x18] sm:$0xff] }
 0x39d   :  { %v2714_v2 = vpop.eup %2237  ;;  %570 = vmatpush.msra.mxu3 %v2164_v63  ;;  %622 = vmatpush.msrb.mxu1 %v2165_v40  ;;  %v790_v40 = vld [vmem:[%s3204_s3 + $0x8] sm:$0xff]  ;;  %v789_v63 = vld [vmem:[%s3204_s3] sm:$0xff] }
 0x39e   :  { %v2240_v41 = vpop.eup %2239  ;;  %v530_v43 = vsel %vm214_vm8, %v2714_v2, 0.0  ;;  %v481_v44 = vpop.xlane.xlu0 %480 }
 0x39f   :  { %v541_v45 = vmul.f32 %v2240_v41, %v2680_v52  ;;  %531 = vadd.xlane.f32.xlu1 %v530_v43  ;;  %v491_v46 = vsub.f32 %v459_v60, %v481_v44 }
 0x3a1   :  { %v505_v48 = vmul.f32 1.442695, %v491_v46  ;;  %2066 = vmatmul.msk.f32.vlgmr.msra.gmra.mxu3 %vm214_vm8, %v541_v45 }
 0x3a2   :  { %v2242_v49 = vpop.eup %2241 }
 0x3a3   :  { %2243 = vpow2.f32 %v505_v48  ;;  %v524_v3 = vsel %vm214_vm8, %v2242_v49, 0.0 }
 0x3a7   :  { %525 = vadd.xlane.f32.xlu1 %v524_v3 }
 0x3a9   :  { %v2244_v50 = vpop.eup %2243 }
 0x3aa   :  { %v527_v51 = vsel %vm214_vm8, %v2244_v50, 0.0 }
 0x3ab   :  { %528 = vadd.xlane.f32.xlu0 %v527_v51 }
 0x3bf   :  { %2167 = vrot.lane.b32.xlu0 %v2166_v54, %s3175_s6 }
 0x3c0   :  { %731 = vrot.lane.b32.xlu1 %v2597_v5, %s3175_s6  ;;  %s3209_s6 = smov 8  }
 0x3e1   :  { %v514_v52 = vpop.xlane.xlu1 %513 }
 0x3e2   :  { %2245 = vrcp.f32 %v514_v52  ;;  %v2204_v52 = vld [vmem:[%s3154_s9] ss:$0 sm:$0xff] }
 0x3e8   :  { %v2246_v56 = vpop.eup %2245 }
 0x3e9   :  { %v542_v8 = vmul.f32 %v2246_v56, %v2696_v13  ;;  %v523_v5 = vpop.xlane.xlu1 %522 }
 0x3ef   :  { %v517_v55 = vpop.xlane.xlu2 %516 }
 0x3f0   :  { %2247 = vrcp.f32 %v517_v55 }
 0x3f6   :  { %v2248_v59 = vpop.eup %2247 }
 0x3f7   :  { %v543_v60 = vmul.f32 %v2248_v59, %v2234_v21  ;;  %v2173_v62 = vpop.permute.xlu2 %2172 }
 0x3f8   :  { %v2175_v4 = vunpack.i.h.bf16 %v2173_v62  ;;  %v2174_v7 = vunpack.i.l.bf16 %v2173_v62 }
 0x3f9   :  { %2068 = vmatmul.msk.f32.vlgmr.msrb.gmra.mxu1 %vm214_vm8, %v543_v60 }
 0x3fa   :  { %596 = vmatpush.msra.mxu0 %v2174_v7  ;;  %726 = vmatpush.msra.mxu1 %v2175_v4 }
 0x3fb   :  { %2067 = vmatmul.msk.f32.vlgmr.msra.gmra.mxu0 %vm214_vm8, %v542_v8 }
 0x3ff   :  { %v680_v1 = vpop.permute.xlu2 %679 }
 0x400   :  { %700 = vmatpush.msrb.mxu0 %v680_v1 }
 0x40a   :  { %v520_v9 = vpop.xlane.xlu0 %519 }
 0x412   :  { %v532_v6 = vpop.xlane.xlu1 %531 }
 0x41a   :  { %v526_v10 = vpop.xlane.xlu1 %525 }
 0x41b   :  { %2249 = vrcp.f32 %v526_v10 }
 0x41e   :  { %v529_v11 = vpop.xlane.xlu0 %528 }
 0x41f   :  { %2251 = vrcp.f32 %v529_v11 }
 0x420   :  { %2253 = vrcp.f32 %v523_v5 }
 0x421   :  { %v2250_v12 = vpop.eup %2249  ;;  %2255 = vrcp.f32 %v520_v9 }
 0x422   :  { %v546_v15 = vmul.f32 %v2250_v12, %v2242_v49  ;;  %2257 = vrcp.f32 %v532_v6 }
 0x424   :  { %2071 = vmatmul.msk.f32.vlgmr.msrb.gmra.mxu0 %vm214_vm8, %v546_v15  ;;  %v572_v33 = vpop.f32.mrf.mxu3 }
 0x425   :  { %v2252_v13 = vpop.eup %2251 }
 0x426   :  { %v547_v17 = vmul.f32 %v2252_v13, %v2244_v50  ;;  %v2254_v18 = vpop.eup %2253 }
 0x427   :  { %v2256_v0 = vpop.eup %2255  ;;  %v545_v24 = vmul.f32 %v2254_v18, %v2700_v61  ;;  %v885_v18 = vld [vmem:[%s3157_s12 + $0x8] sm:$0xff] }
 0x428   :  { %2072 = vmatmul.msk.f32.vlgmr.msra.gmra.mxu1 %vm214_vm8, %v547_v17  ;;  %v544_v25 = vmul.f32 %v2256_v0, %v2708_v31  ;;  %v2258_v27 = vpop.eup %2257  ;;  %v886_v17 = vld [vmem:[%s3157_s12 + $0x10] sm:$0xff]  ;;  %v884_v0 = vld [vmem:[%s3157_s12] sm:$0xff] }
 0x429   :  { %v548_v28 = vmul.f32 %v2258_v27, %v2714_v2 }
 0x431   :  { %v2168_v19 = vpop.permute.xlu0 %2167 }
 0x432   :  { %v2170_v21 = vunpack.i.h.bf16 %v2168_v19  ;;  %v2169_v22 = vunpack.i.l.bf16 %v2168_v19  ;;  %v732_v26 = vpop.permute.xlu1 %731 }
 0x434   :  { %648 = vmatpush.msra.mxu2 %v2170_v21  ;;  %674 = vmatpush.msrb.mxu3 %v2169_v22 }
 0x435   :  { %2069 = vmatmul.msk.f32.vlgmr.msra.gmra.mxu2 %vm214_vm8, %v544_v25  ;;  %2070 = vmatmul.msk.f32.vlgmr.msrb.gmra.mxu3 %vm214_vm8, %v545_v24 }
 0x436   :  { %752 = vmatpush.msrb.mxu2 %v732_v26  ;;  %815 = vmatpush.msra.mxu3 %v792_v38 }
 0x438   :  { %816 = vmatpush.msra.mxu3 %v791_v39 }
 0x43a   :  { %817 = vmatpush.msra.mxu3 %v790_v40 }
 0x43c   :  { %818 = vmatpush.msra.mxu3 %v789_v63 }
 0x43d   :  { %2073 = vmatmul.msk.f32.vlgmr.msrb.gmra.mxu2 %vm214_vm8, %v548_v28 }
 0x476   :  { %v624_v29 = vpop.f32.mrf.mxu1 }
 0x477   :  { %759 = vrot.lane.b32.xlu0 %v624_v29, %s3185_s29 }
 0x478   :  { %v598_v61 = vpop.f32.mrf.mxu0 }
 0x4a1   :  { %v702_v31 = vpop.f32.mrf.mxu0 }
 0x4a5   :  { %v728_v32 = vpop.f32.mrf.mxu1 }
 0x4a6   :  { %775 = vrot.lane.b32.xlu0 %v728_v32, %s3183_s2 }
 0x4ae   :  { %769 = vrot.lane.b32.xlu0 %v702_v31, %s3179_s0 }
 0x4b8   :  { %v650_v34 = vpop.f32.mrf.mxu2  ;;  %v676_v36 = vpop.f32.mrf.mxu3 }
 0x4b9   :  { %767 = vrot.lane.b32.xlu2 %v676_v36, %s3179_s0  ;;  %s3210_s0 = smov 24  }
 0x4c0   :  { %v754_v37 = vpop.f32.mrf.mxu2 }
 0x4c1   :  { %777 = vrot.lane.b32.xlu1 %v754_v37, %s3183_s2  ;;  %761 = vrot.lane.b32.xlu2 %v650_v34, %s3185_s29 }
 0x4e9   :  { %v760_v2 = vpop.permute.xlu0 %759 }
 0x4ea   :  { %v781_v43 = vsel %vm214_vm8, %v572_v33, %v760_v2  ;;  %v2206_v33 = vld [vmem:[%s3156_s11] ss:$0 sm:$0xff] }
 0x513   :  { %v768_v41 = vpop.permute.xlu2 %767 }
 0x514   :  { %v784_v44 = vsel %vm783_vm9, %v781_v43, %v768_v41 }
 0x518   :  { %v776_v45 = vpop.permute.xlu0 %775 }
 0x519   :  { %v787_v46 = vsel %vm786_vm10, %v784_v44, %v776_v45 }
 0x51a   :  { %2074 = vmatmul.msk.f32.vlgmr.msra.gmra.mxu3 %vm91_vm0, %v787_v46 }
 0x51b   :  { %v762_v48 = vpop.permute.xlu2 %761 }
 0x51c   :  { %v782_v3 = vsel %vm214_vm8, %v598_v61, %v762_v48  ;;  %v2205_v61 = vld [vmem:[%s3155_s10] ss:$0 sm:$0xff] }
 0x520   :  { %v770_v49 = vpop.permute.xlu0 %769 }
 0x521   :  { %v785_v50 = vsel %vm783_vm9, %v782_v3, %v770_v49  ;;  %v946_v3 = vld [vmem:[%s3159_s14 + $0x38] sm:$0xff] }
 0x522   :  { %966 = vmatpush.msrb.mxu1 %v946_v3 }
 0x533   :  { %v778_v51 = vpop.permute.xlu1 %777 }
 0x534   :  { %v788_v54 = vsel %vm786_vm10, %v785_v50, %v778_v51  ;;  %v945_v50 = vld [vmem:[%s3159_s14 + $0x30] sm:$0xff]  ;;  %v944_v51 = vld [vmem:[%s3159_s14 + $0x28] sm:$0xff] }
 0x535   :  { %2075 = vmatmul.msk.f32.gmra.mxu3 %vm91_vm0, %v788_v54  ;;  %967 = vmatpush.msrb.mxu1 %v945_v50  ;;  %v943_v54 = vld [vmem:[%s3159_s14 + $0x20] sm:$0xff] }
 0x537   :  { %968 = vmatpush.msrb.mxu1 %v944_v51 }
 0x539   :  { %969 = vmatpush.msrb.mxu1 %v943_v54 }
 0x59d   :  { %v820_v55 = vpop.f32.mrf.mxu3 }
 0x59e   :  { %v821_v56 = vadd.f32 %v2204_v52, %v820_v55  ;;  %v941_v55 = vld [vmem:[%s3159_s14 + $0x10] sm:$0xff] }
 0x5a0   :  { %v826_v59 = vadd.f32 %v821_v56, %v2554_v53  ;;  %v940_v56 = vld [vmem:[%s3159_s14 + $0x8] sm:$0xff] }
 0x5a2   :  { %v830_v60 = vsel %vm91_vm0, %v826_v59, 0.0 }
 0x5a3   :  { %831 = vadd.xlane.f32.xlu2 %v830_v60  ;;  %v2207_v60 = vld [vmem:[%s3158_s13] ss:$0 sm:$0xff] }
 0x5b8   :  { %v823_v62 = vpop.f32.mrf.mxu3 }
 0x5b9   :  { %v824_v4 = vadd.f32 %v2204_v52, %v823_v62  ;;  %v942_v52 = vld [vmem:[%s3159_s14 + $0x18] sm:$0xff] }
 0x5ba   :  { %970 = vmatpush.msrb.mxu1 %v942_v52 }
 0x5bb   :  { %v827_v7 = vadd.f32 %v824_v4, %v2558_v58  ;;  %v887_v58 = vld [vmem:[%s3157_s12 + $0x18] sm:$0xff] }
 0x5bc   :  { %910 = vmatpush.msra.mxu0 %v887_v58  ;;  %971 = vmatpush.msrb.mxu1 %v941_v55 }
 0x5bd   :  { %v833_v8 = vsel %vm91_vm0, %v827_v7, 0.0 }
 0x5be   :  { %834 = vadd.xlane.f32.xlu0 %v833_v8  ;;  %911 = vmatpush.msra.mxu0 %v886_v17 }
 0x5bf   :  { %972 = vmatpush.msrb.mxu1 %v940_v56 }
 0x5c0   :  { %912 = vmatpush.msra.mxu0 %v885_v18 }
 0x5c2   :  { %913 = vmatpush.msra.mxu0 %v884_v0 }
 0x616   :  { %v832_v1 = vpop.xlane.xlu2 %831 }
 0x617   :  { %v836_v5 = vmul.f32 %v832_v1, %v2528_v16 }
 0x619   :  { %v838_v6 = vsub.f32 %v826_v59, %v836_v5  ;;  %v939_v59 = vld [vmem:[%s3159_s14] sm:$0xff] }
 0x61a   :  { %973 = vmatpush.msrb.mxu1 %v939_v59 }
 0x61b   :  { %v840_v9 = vmul.f32 %v838_v6, %v838_v6 }
 0x61d   :  { %v842_v10 = vsel %vm91_vm0, %v840_v9, 0.0 }
 0x61e   :  { %843 = vadd.xlane.f32.xlu1 %v842_v10 }
 0x631   :  { %v835_v11 = vpop.xlane.xlu0 %834 }
 0x632   :  { %v837_v53 = vmul.f32 %v835_v11, %v2528_v16 }
 0x634   :  { %v839_v12 = vsub.f32 %v827_v7, %v837_v53 }
 0x636   :  { %v841_v15 = vmul.f32 %v839_v12, %v839_v12 }
 0x638   :  { %v845_v13 = vsel %vm91_vm0, %v841_v15, 0.0 }
 0x639   :  { %846 = vadd.xlane.f32.xlu2 %v845_v13 }
 0x691   :  { %v844_v19 = vpop.xlane.xlu1 %843 }
 0x692   :  { %v848_v21 = vmul.f32 %v844_v19, %v2528_v16 }
 0x694   :  { %v850_v22 = vadd.f32 1e-12, %v848_v21 }
 0x696   :  { %2259 = vrsqrt.f32 %v850_v22  ;;  %vm858_vm12 = vweird.f32 %v850_v22 }
 0x69c   :  { %v2260_v24 = vpop.eup %2259 }
 0x69d   :  { %v853_v25 = vmul.f32 %v2260_v24, %v850_v22  ;;  %vm859_vm11 = vweird.f32 %v2260_v24 }
 0x69e   :  { %vm860_vm13 = vmor %vm858_vm12, %vm859_vm11 }
 0x69f   :  { %v854_v26 = vmul.f32 %v2260_v24, %v853_v25  ;;  %v2208_v25 = vld [vmem:[%s3160_s15] ss:$0 sm:$0xff] }
 0x6a1   :  { %v855_v27 = vmul.f32 0.5, %v854_v26 }
 0x6a3   :  { %v856_v28 = vsub.f32 1.5, %v855_v27 }
 0x6a5   :  { %v857_v29 = vmul.f32 %v2260_v24, %v856_v28 }
 0x6a7   :  { %v861_v32 = vsel %vm860_vm13, %v2260_v24, %v857_v29 }
 0x6a8   :  { %v872_v31 = vmul.f32 %v861_v32, %v838_v6 }
 0x6aa   :  { %v877_v34 = vmul.f32 %v2205_v61, %v872_v31 }
 0x6ac   :  { %v847_v36 = vpop.xlane.xlu2 %846  ;;  %v2794_v37 = vadd.f32 %v2206_v33, %v877_v34 }
 0x6ad   :  { %v849_v38 = vmul.f32 %v847_v36, %v2528_v16 }
 0x6ae   :  { %2076 = vmatmul.msk.f32.vlgmr.msra.gmra.mxu0 %vm91_vm0, %v2794_v37 }
 0x6af   :  { %v851_v39 = vadd.f32 1e-12, %v849_v38 }
 0x6b1   :  { %2261 = vrsqrt.f32 %v851_v39  ;;  %vm868_vm15 = vweird.f32 %v851_v39 }
 0x6b7   :  { %v2262_v40 = vpop.eup %2261 }
 0x6b8   :  { %v863_v63 = vmul.f32 %v2262_v40, %v851_v39  ;;  %vm869_vm14 = vweird.f32 %v2262_v40 }
 0x6b9   :  { %vm870_vm1 = vmor %vm868_vm15, %vm869_vm14 }
 0x6ba   :  { %v864_v2 = vmul.f32 %v2262_v40, %v863_v63 }
 0x6bc   :  { %v865_v41 = vmul.f32 0.5, %v864_v2 }
 0x6be   :  { %v866_v43 = vsub.f32 1.5, %v865_v41 }
 0x6c0   :  { %v867_v44 = vmul.f32 %v2262_v40, %v866_v43 }
 0x6c2   :  { %v871_v45 = vsel %vm870_vm1, %v2262_v40, %v867_v44  ;;  %v2083_v44 = vld [vmem:[%s3199_s4 + $0x38] sm:$0xff] }
 0x6c3   :  { %v873_v46 = vmul.f32 %v871_v45, %v839_v12  ;;  %1067 = vmatpush.msra.mxu2 %v2083_v44  ;;  %v2082_v45 = vld [vmem:[%s3199_s4 + $0x30] sm:$0xff] }
 0x6c5   :  { %v878_v48 = vmul.f32 %v2205_v61, %v873_v46  ;;  %1068 = vmatpush.msra.mxu2 %v2082_v45  ;;  %v2081_v46 = vld [vmem:[%s3199_s4 + $0x28] sm:$0xff] }
 0x6c7   :  { %v883_v49 = vadd.f32 %v2206_v33, %v878_v48  ;;  %1069 = vmatpush.msra.mxu2 %v2081_v46  ;;  %v2080_v48 = vld [vmem:[%s3199_s4 + $0x20] sm:$0xff]  ;;  %s2023_s4 = sshll.u32 %s3168_s23, 4  ;;  %s2388_s23 = smov [#allocation4]   ;;  %s2024_s4 = int_to_ptr.hbm [resolvable:$true] %s2023_s4 }
 0x6c9   :  { %2077 = vmatmul.msk.f32.gmra.mxu0 %vm91_vm0, %v883_v49  ;;  %1070 = vmatpush.msra.mxu2 %v2080_v48 }
 0x72b   :  { %v915_v62 = vpop.f32.mrf.mxu0 }
 0x72c   :  { %v916_v4 = vadd.f32 %v2207_v60, %v915_v62 }
 0x72e   :  { %v921_v7 = vmul.f32 %v916_v4, %v916_v4 }
 0x730   :  { %v923_v8 = vmul.f32 %v921_v7, %v916_v4  ;;  %v2210_v7 = vld [vmem:[%s3162_s17] ss:$0 sm:$0xff] }
 0x732   :  { %v925_v1 = vmul.f32 0.044715, %v923_v8 }
 0x734   :  { %v927_v5 = vadd.f32 %v925_v1, %v916_v4 }
 0x736   :  { %v929_v6 = vmul.f32 0.7978846, %v927_v5 }
 0x738   :  { %2263 = vtanh.f32 %v929_v6 }
 0x73e   :  { %v2264_v9 = vpop.eup %2263 }
 0x73f   :  { %v933_v10 = vadd.f32 1.0, %v2264_v9 }
 0x741   :  { %v935_v11 = vmul.f32 0.5, %v933_v10 }
 0x743   :  { %v937_v53 = vmul.f32 %v935_v11, %v916_v4 }
 0x745   :  { %2078 = vmatmul.msk.f32.vlgmr.msrb.gmra.mxu1 %vm951_vm2, %v937_v53 }
 0x746   :  { %v918_v12 = vpop.f32.mrf.mxu0 }
 0x747   :  { %v919_v15 = vadd.f32 %v2207_v60, %v918_v12  ;;  %v2209_v60 = vld [vmem:[%s3161_s16] ss:$0 sm:$0xff] }
 0x749   :  { %v922_v13 = vmul.f32 %v919_v15, %v919_v15 }
 0x74b   :  { %v924_v58 = vmul.f32 %v922_v13, %v919_v15 }
 0x74d   :  { %v926_v17 = vmul.f32 0.044715, %v924_v58 }
 0x74f   :  { %v928_v18 = vadd.f32 %v926_v17, %v919_v15 }
 0x751   :  { %v930_v0 = vmul.f32 0.7978846, %v928_v18 }
 0x753   :  { %2265 = vtanh.f32 %v930_v0 }
 0x759   :  { %v2266_v19 = vpop.eup %2265 }
 0x75a   :  { %v934_v21 = vadd.f32 1.0, %v2266_v19  ;;  %v2211_v19 = vld [vmem:[%s3202_s1 + $0x1] ss:$0 sm:$0xff]  ;;  %s3206_s1 = smov 96  }
 0x75c   :  { %v936_v22 = vmul.f32 0.5, %v934_v21 }
 0x75e   :  { %v938_v24 = vmul.f32 %v936_v22, %v919_v15 }
 0x760   :  { %2079 = vmatmul.msk.f32.gmra.mxu1 %vm951_vm2, %v938_v24 }
 0x7c2   :  { %v975_v26 = vpop.f32.mrf.mxu1 }
 0x7c3   :  { %v976_v27 = vadd.f32 %v2208_v25, %v975_v26 }
 0x7c5   :  { %v981_v28 = vadd.f32 %v976_v27, %v2794_v37 }
 0x7c7   :  { %v985_v29 = vsel %vm91_vm0, %v981_v28, 0.0 }
 0x7c8   :  { %986 = vadd.xlane.f32.xlu0 %v985_v29 }
 0x7dd   :  { %v978_v61 = vpop.f32.mrf.mxu1 }
 0x7de   :  { %v979_v32 = vadd.f32 %v2208_v25, %v978_v61 }
 0x7e0   :  { %v982_v31 = vadd.f32 %v979_v32, %v883_v49 }
 0x7e2   :  { %v988_v33 = vsel %vm91_vm0, %v982_v31, 0.0 }
 0x7e3   :  { %989 = vadd.xlane.f32.xlu1 %v988_v33 }
 0x83b   :  { %v987_v34 = vpop.xlane.xlu0 %986 }
 0x83c   :  { %v991_v36 = vmul.f32 %v987_v34, %v2528_v16 }
 0x83e   :  { %v993_v38 = vsub.f32 %v981_v28, %v991_v36 }
 0x840   :  { %v995_v39 = vmul.f32 %v993_v38, %v993_v38 }
 0x842   :  { %v997_v40 = vsel %vm91_vm0, %v995_v39, 0.0 }
 0x843   :  { %998 = vadd.xlane.f32.xlu2 %v997_v40 }
 0x856   :  { %v990_v63 = vpop.xlane.xlu1 %989 }
 0x857   :  { %v992_v37 = vmul.f32 %v990_v63, %v2528_v16 }
 0x859   :  { %v994_v2 = vsub.f32 %v982_v31, %v992_v37 }
 0x85b   :  { %v996_v41 = vmul.f32 %v994_v2, %v994_v2 }
 0x85d   :  { %v1000_v43 = vsel %vm91_vm0, %v996_v41, 0.0 }
 0x85e   :  { %1001 = vadd.xlane.f32.xlu0 %v1000_v43 }
 0x8b6   :  { %v999_v49 = vpop.xlane.xlu2 %998 }
 0x8b7   :  { %v1003_v3 = vmul.f32 %v999_v49, %v2528_v16 }
 0x8b9   :  { %v1005_v50 = vadd.f32 1e-12, %v1003_v3 }
 0x8bb   :  { %2267 = vrsqrt.f32 %v1005_v50  ;;  %vm1013_vm4 = vweird.f32 %v1005_v50 }
 0x8c1   :  { %v2268_v51 = vpop.eup %2267 }
 0x8c2   :  { %v1008_v54 = vmul.f32 %v2268_v51, %v1005_v50  ;;  %vm1014_vm3 = vweird.f32 %v2268_v51 }
 0x8c3   :  { %vm1015_vm5 = vmor %vm1013_vm4, %vm1014_vm3 }
 0x8c4   :  { %v1009_v52 = vmul.f32 %v2268_v51, %v1008_v54 }
 0x8c6   :  { %v1010_v55 = vmul.f32 0.5, %v1009_v52 }
 0x8c8   :  { %v1011_v56 = vsub.f32 1.5, %v1010_v55 }
 0x8ca   :  { %v1012_v59 = vmul.f32 %v2268_v51, %v1011_v56 }
 0x8cc   :  { %v1016_v62 = vsel %vm1015_vm5, %v2268_v51, %v1012_v59 }
 0x8cd   :  { %v1027_v4 = vmul.f32 %v1016_v62, %v993_v38 }
 0x8cf   :  { %v1032_v8 = vmul.f32 %v2209_v60, %v1027_v4 }
 0x8d1   :  { %v1002_v1 = vpop.xlane.xlu0 %1001  ;;  %v2858_v5 = vadd.f32 %v2210_v7, %v1032_v8 }
 0x8d2   :  { %v1004_v6 = vmul.f32 %v1002_v1, %v2528_v16 }
 0x8d3   :  { %2085 = vmatmul.msk.f32.vlgmr.msra.gmra.mxu2 %vm91_vm0, %v2858_v5 }
 0x8d4   :  { %v1006_v9 = vadd.f32 1e-12, %v1004_v6 }
 0x8d6   :  { %2269 = vrsqrt.f32 %v1006_v9  ;;  %vm1023_vm7 = vweird.f32 %v1006_v9 }
 0x8dc   :  { %v2270_v10 = vpop.eup %2269 }
 0x8dd   :  { %v1018_v11 = vmul.f32 %v2270_v10, %v1006_v9  ;;  %vm1024_vm6 = vweird.f32 %v2270_v10 }
 0x8de   :  { %vm1025_vm11 = vmor %vm1023_vm7, %vm1024_vm6  ;;  %vm1912_vm6 = vcmask 1041409   ;;  %vm1968_vm7 = vcmask 17408  }
 0x8df   :  { %v1019_v53 = vmul.f32 %v2270_v10, %v1018_v11 }
 0x8e1   :  { %v1020_v12 = vmul.f32 0.5, %v1019_v53 }
 0x8e3   :  { %v1021_v15 = vsub.f32 1.5, %v1020_v12 }
 0x8e5   :  { %v1022_v13 = vmul.f32 %v2270_v10, %v1021_v15 }
 0x8e7   :  { %v1026_v58 = vsel %vm1025_vm11, %v2270_v10, %v1022_v13 }
 0x8e8   :  { %v1028_v17 = vmul.f32 %v1026_v58, %v994_v2 }
 0x8ea   :  { %v1033_v18 = vmul.f32 %v2209_v60, %v1028_v17 }
 0x8ec   :  { %v2863_v0 = vadd.f32 %v2210_v7, %v1033_v18 }
 0x8ee   :  { %2086 = vmatmul.msk.f32.gmra.mxu2 %vm91_vm0, %v2863_v0 }
 0x956   :  { %v1072_v21 = vpop.f32.mrf.mxu2 }
 0x957   :  { %v2870_v22 = vadd.f32 %v2211_v19, %v1072_v21 }
 0x959   :  { %1088 = vrot.lane.b32.xlu0 %v2870_v22, %s2378_s27  ;;  %1080 = vrot.lane.b32.xlu1 %v2870_v22, %s2376_s5 }
 0x961   :  { %1084 = vrot.lane.b32.xlu0 %v2870_v22, %s3205_s28 }
 0x971   :  { %v1075_v24 = vpop.f32.mrf.mxu2 }
 0x972   :  { %v2878_v25 = vadd.f32 %v2211_v19, %v1075_v24 }
 0x974   :  { %1082 = vrot.lane.b32.xlu2 %v2878_v25, %s2376_s5  ;;  %1090 = vrot.lane.b32.xlu1 %v2878_v25, %s2378_s27  ;;  %s3207_s5 = smov 64   ;;  %s3208_s27 = smov 16  }
 0x97c   :  { %1086 = vrot.lane.b32.xlu2 %v2878_v25, %s3205_s28  ;;  %1092 = vrot.lane.b32.xlu1 %v2870_v22, %s3206_s1 }
 0x9cb   :  { %v2888_v26 = vpop.permute.xlu0 %1088  ;;  %v2890_v27 = vpop.permute.xlu1 %1080 }
 0x9cc   :  { %1248 = vrot.lane.b32.xlu1 %v2888_v26, %s3206_s1  ;;  %1144 = vrot.lane.b32.xlu0 %v2890_v27, %s3206_s1 }
 0x9ce   :  { %v2896_v28 = vpop.permute.xlu2 %1082 }
 0x9cf   :  { %1170 = vrot.lane.b32.xlu2 %v2896_v28, %s3206_s1 }
 0x9d3   :  { %v2900_v29 = vpop.permute.xlu0 %1084 }
 0x9d4   :  { %1196 = vrot.lane.b32.xlu1 %v2900_v29, %s3206_s1  ;;  %1118 = vrot.lane.b32.xlu0 %v2878_v25, %s3206_s1 }
 0x9d6   :  { %v2906_v61 = vpop.permute.xlu2 %1086 }
 0x9dc   :  { %1222 = vrot.lane.b32.xlu0 %v2906_v61, %s3206_s1 }
 0x9e6   :  { %v2910_v32 = vpop.permute.xlu1 %1090 }
 0x9e7   :  { %1274 = vrot.lane.b32.xlu2 %v2910_v32, %s3206_s1 }
 0x9ee   :  { %v1093_v31 = vpop.permute.xlu1 %1092 }
 0x9ef   :  { %2087 = vmatpush.xpose.msk.msrb.mxu3 %vm214_vm8, %v1093_v31 }
 0x9f2   :  { %2088 = vmatmul.msk.f32.vlgmr.msrb.gmra.mxu3 %vm214_vm8, %v2870_v22 }
 0xa29   :  { %v1171_v33 = vpop.permute.xlu2 %1170 }
 0xa2a   :  { %2093 = vmatpush.xpose.msk.msra.mxu3 %vm214_vm8, %v1171_v33 }
 0xa2d   :  { %2094 = vmatmul.msk.f32.vlgmr.msra.gmra.mxu3 %vm214_vm8, %v2896_v28 }
 0xa3e   :  { %v1145_v34 = vpop.permute.xlu0 %1144  ;;  %v1249_v36 = vpop.permute.xlu1 %1248 }
 0xa3f   :  { %2091 = vmatpush.xpose.msk.msrb.mxu2 %vm214_vm8, %v1145_v34 }
 0xa41   :  { %v1275_v38 = vpop.permute.xlu2 %1274 }
 0xa42   :  { %2092 = vmatmul.msk.f32.vlgmr.msrb.gmra.mxu2 %vm214_vm8, %v2890_v27  ;;  %2101 = vmatpush.xpose.msk.msrb.mxu3 %vm214_vm8, %v1275_v38 }
 0xa43   :  { %2099 = vmatpush.xpose.msk.msra.mxu2 %vm214_vm8, %v1249_v36 }
 0xa45   :  { %2102 = vmatmul.msk.f32.vlgmr.msrb.gmra.mxu3 %vm214_vm8, %v2910_v32 }
 0xa46   :  { %v1119_v39 = vpop.permute.xlu0 %1118  ;;  %v1197_v40 = vpop.permute.xlu1 %1196 }
 0xa47   :  { %2089 = vmatpush.xpose.msk.msrb.mxu0 %vm214_vm8, %v1119_v39 }
 0xa4a   :  { %2090 = vmatmul.msk.f32.vlgmr.msrb.gmra.mxu0 %vm214_vm8, %v2878_v25  ;;  %2100 = vmatmul.msk.f32.vlgmr.msra.gmra.mxu2 %vm214_vm8, %v2888_v26 }
 0xa4b   :  { %2095 = vmatpush.xpose.msk.msra.mxu0 %vm214_vm8, %v1197_v40 }
 0xa4e   :  { %v1223_v63 = vpop.permute.xlu0 %1222 }
 0xa4f   :  { %2097 = vmatpush.xpose.msk.msra.mxu1 %vm214_vm8, %v1223_v63 }
 0xa52   :  { %2096 = vmatmul.msk.f32.vlgmr.msra.gmra.mxu0 %vm214_vm8, %v2900_v29  ;;  %2098 = vmatmul.msk.f32.vlgmr.msra.gmra.mxu1 %vm214_vm8, %v2906_v61 }
 0xa75   :  { %v1115_v37 = vpop.f32.mrf.mxu3 }
 0xa76   :  { %v1300_v2 = vmul.f32 0.35355338, %v1115_v37 }
 0xa78   :  { %v1308_v41 = vadd.f32 %v2636_v14, %v1300_v2 }
 0xa7a   :  { %v1316_v43 = vsel %vm214_vm8, %v1308_v41, -inf }
 0xa7b   :  { %1317 = vmax.xlane.f32.xlu1 %v1316_v43 }
 0xab0   :  { %v1193_v45 = vpop.f32.mrf.mxu3 }
 0xab1   :  { %v1303_v1 = vmul.f32 0.35355338, %v1193_v45 }
 0xab3   :  { %v1311_v11 = vadd.f32 %v2664_v35, %v1303_v1  ;;  %v2186_v35 = vpack.i.bf16 %v2900_v29, %v2878_v25 }
 0xab5   :  { %v1325_v53 = vsel %vm214_vm8, %v1311_v11, -inf }
 0xac5   :  { %v1167_v44 = vpop.f32.mrf.mxu2 }
 0xac6   :  { %v1302_v46 = vmul.f32 0.35355338, %v1167_v44 }
 0xac7   :  { %v1141_v48 = vpop.f32.mrf.mxu0 }
 0xac8   :  { %v1301_v49 = vmul.f32 0.35355338, %v1141_v48  ;;  %v1310_v3 = vadd.f32 %v2657_v30, %v1302_v46  ;;  %v1297_v14 = vpop.f32.mrf.mxu3 }
 0xac9   :  { %v1307_v7 = vmul.f32 0.35355338, %v1297_v14 }
 0xaca   :  { %v1322_v50 = vsel %vm214_vm8, %v1310_v3, -inf  ;;  %v1309_v51 = vadd.f32 %v2648_v23, %v1301_v49 }
 0xacb   :  { %1323 = vmax.xlane.f32.xlu2 %v1322_v50  ;;  %v1315_v10 = vadd.f32 %v2671_v42, %v1307_v7  ;;  %v2176_v42 = vpack.i.bf16 %v2870_v22, %v2890_v27 }
 0xacc   :  { %v1319_v54 = vsel %vm214_vm8, %v1309_v51, -inf }
 0xacd   :  { %1320 = vmax.xlane.f32.xlu1 %v1319_v54  ;;  %v1271_v52 = vpop.f32.mrf.mxu2 }
 0xace   :  { %v1306_v55 = vmul.f32 0.35355338, %v1271_v52 }
 0xacf   :  { %v1219_v56 = vpop.f32.mrf.mxu0  ;;  %v1245_v59 = vpop.f32.mrf.mxu1 }
 0xad0   :  { %v1304_v60 = vmul.f32 0.35355338, %v1219_v56  ;;  %v1305_v62 = vmul.f32 0.35355338, %v1245_v59  ;;  %v1314_v4 = vadd.f32 %v2688_v57, %v1306_v55  ;;  %v1337_v57 = vsel %vm214_vm8, %v1315_v10, -inf }
 0xad2   :  { %v1334_v30 = vsel %vm214_vm8, %v1314_v4, -inf  ;;  %v1313_v8 = vadd.f32 %v2677_v47, %v1305_v62  ;;  %v1312_v23 = vadd.f32 %v2643_v20, %v1304_v60  ;;  %v2181_v62 = vpack.i.bf16 %v2888_v26, %v2896_v28 }
 0xad3   :  { %1335 = vmax.xlane.f32.xlu2 %v1334_v30 }
 0xad4   :  { %v1331_v6 = vsel %vm214_vm8, %v1313_v8, -inf  ;;  %v1328_v9 = vsel %vm214_vm8, %v1312_v23, -inf }
 0xad5   :  { %1332 = vmax.xlane.f32.xlu1 %v1331_v6  ;;  %1329 = vmax.xlane.f32.xlu0 %v1328_v9 }
 0xadb   :  { %1338 = vmax.xlane.f32.xlu2 %v1337_v57 }
 0xadd   :  { %1326 = vmax.xlane.f32.xlu0 %v1325_v53 }
 0xaee   :  { %v1318_v47 = vpop.xlane.xlu1 %1317 }
 0xaef   :  { %v1340_v20 = vsub.f32 %v1308_v41, %v1318_v47 }
 0xaf1   :  { %v1348_v12 = vmul.f32 1.442695, %v1340_v20 }
 0xaf3   :  { %2271 = vpow2.f32 %v1348_v12 }
 0xaf9   :  { %v2954_v15 = vpop.eup %2271 }
 0xafa   :  { %v1364_v13 = vsel %vm214_vm8, %v2954_v15, 0.0 }
 0xafb   :  { %1365 = vadd.xlane.f32.xlu2 %v1364_v13 }
 0xb13   :  { %2177 = vrot.lane.b32.xlu2 %v2176_v42, %s3207_s5 }
 0xb1b   :  { %2187 = vrot.lane.b32.xlu2 %v2186_v35, %s3207_s5 }
 0xb23   :  { %1534 = vrot.lane.b32.xlu2 %v2906_v61, %s3207_s5 }
 0xb3e   :  { %v1324_v19 = vpop.xlane.xlu2 %1323 }
 0xb3f   :  { %v1342_v22 = vsub.f32 %v1310_v3, %v1324_v19 }
 0xb40   :  { %v1321_v58 = vpop.xlane.xlu1 %1320 }
 0xb41   :  { %v1341_v17 = vsub.f32 %v1309_v51, %v1321_v58  ;;  %v1352_v29 = vmul.f32 1.442695, %v1342_v22 }
 0xb43   :  { %v1350_v18 = vmul.f32 1.442695, %v1341_v17 }
 0xb45   :  { %2273 = vpow2.f32 %v1350_v18 }
 0xb46   :  { %v1336_v25 = vpop.xlane.xlu2 %1335 }
 0xb47   :  { %v1346_v38 = vsub.f32 %v1314_v4, %v1336_v25 }
 0xb48   :  { %v1330_v21 = vpop.xlane.xlu0 %1329  ;;  %v1333_v34 = vpop.xlane.xlu1 %1332 }
 0xb49   :  { %v1344_v24 = vsub.f32 %v1312_v23, %v1330_v21  ;;  %v1345_v40 = vsub.f32 %v1313_v8, %v1333_v34  ;;  %v1360_v2 = vmul.f32 1.442695, %v1346_v38 }
 0xb4b   :  { %v2966_v31 = vpop.eup %2273  ;;  %v1356_v27 = vmul.f32 1.442695, %v1344_v24  ;;  %v1358_v41 = vmul.f32 1.442695, %v1345_v40 }
 0xb4c   :  { %v1367_v33 = vsel %vm214_vm8, %v2966_v31, 0.0 }
 0xb4d   :  { %2275 = vpow2.f32 %v1356_v27  ;;  %1368 = vadd.xlane.f32.xlu1 %v1367_v33 }
 0xb4e   :  { %2277 = vpow2.f32 %v1352_v29  ;;  %v1339_v43 = vpop.xlane.xlu2 %1338 }
 0xb4f   :  { %v1347_v46 = vsub.f32 %v1315_v10, %v1339_v43 }
 0xb50   :  { %v1327_v61 = vpop.xlane.xlu0 %1326 }
 0xb51   :  { %v1343_v36 = vsub.f32 %v1311_v11, %v1327_v61  ;;  %v1362_v3 = vmul.f32 1.442695, %v1347_v46 }
 0xb53   :  { %v2276_v39 = vpop.eup %2275  ;;  %v1354_v63 = vmul.f32 1.442695, %v1343_v36 }
 0xb54   :  { %v1376_v37 = vsel %vm214_vm8, %v2276_v39, 0.0  ;;  %v2278_v44 = vpop.eup %2277 }
 0xb55   :  { %2279 = vpow2.f32 %v1354_v63  ;;  %1377 = vadd.xlane.f32.xlu0 %v1376_v37  ;;  %v1370_v48 = vsel %vm214_vm8, %v2278_v44, 0.0  ;;  %v2114_v63 = vld [vmem:[%s3204_s3 + $0x38] sm:$0xff]  ;;  %v2113_v37 = vld [vmem:[%s3204_s3 + $0x30] sm:$0xff] }
 0xb56   :  { %2281 = vpow2.f32 %v1360_v2  ;;  %v2112_v2 = vld [vmem:[%s3204_s3 + $0x28] sm:$0xff] }
 0xb57   :  { %2283 = vpow2.f32 %v1358_v41  ;;  %v2111_v41 = vld [vmem:[%s3204_s3 + $0x20] sm:$0xff] }
 0xb58   :  { %2285 = vpow2.f32 %v1362_v3 }
 0xb5b   :  { %v2971_v45 = vpop.eup %2279 }
 0xb5c   :  { %v1373_v49 = vsel %vm214_vm8, %v2971_v45, 0.0  ;;  %v2282_v50 = vpop.eup %2281 }
 0xb5d   :  { %1371 = vadd.xlane.f32.xlu0 %v1370_v48  ;;  %1374 = vadd.xlane.f32.xlu1 %v1373_v49  ;;  %v2284_v51 = vpop.eup %2283  ;;  %v1382_v54 = vsel %vm214_vm8, %v2282_v50, 0.0 }
 0xb5e   :  { %v1379_v52 = vsel %vm214_vm8, %v2284_v51, 0.0  ;;  %v2286_v14 = vpop.eup %2285 }
 0xb5f   :  { %v1385_v55 = vsel %vm214_vm8, %v2286_v14, 0.0 }
 0xb65   :  { %1383 = vadd.xlane.f32.xlu0 %v1382_v54  ;;  %1380 = vadd.xlane.f32.xlu1 %v1379_v52 }
 0xb6d   :  { %1386 = vadd.xlane.f32.xlu1 %v1385_v55  ;;  %v2212_v55 = vld [vmem:[%s3154_s9 + $0x1] ss:$0 sm:$0xff] }
 0xb6e   :  { %v1366_v56 = vpop.xlane.xlu2 %1365 }
 0xb6f   :  { %2287 = vrcp.f32 %v1366_v56 }
 0xb75   :  { %v2288_v59 = vpop.eup %2287 }
 0xb76   :  { %v2178_v60 = vpop.permute.xlu2 %2177  ;;  %v1396_v30 = vmul.f32 %v2288_v59, %v2954_v15 }
 0xb77   :  { %v2180_v4 = vunpack.i.h.bf16 %v2178_v60  ;;  %v2179_v7 = vunpack.i.l.bf16 %v2178_v60 }
 0xb79   :  { %2182 = vrot.lane.b32.xlu0 %v2181_v62, %s3207_s5  ;;  %1425 = vmatpush.msrb.mxu0 %v2180_v4 }
 0xb7a   :  { %1477 = vmatpush.msrb.mxu2 %v2179_v7  ;;  %2103 = vmatmul.msk.f32.vlgmr.msrb.gmra.mxu0 %vm214_vm8, %v1396_v30 }
 0xb7e   :  { %v2188_v8 = vpop.permute.xlu2 %2187 }
 0xb7f   :  { %v2190_v23 = vunpack.i.h.bf16 %v2188_v8  ;;  %v2189_v1 = vunpack.i.l.bf16 %v2188_v8 }
 0xb81   :  { %1451 = vmatpush.msrb.mxu1 %v2189_v1  ;;  %1529 = vmatpush.msra.mxu0 %v2190_v23 }
 0xb83   :  { %1670 = vmatpush.msrb.mxu0 %v2114_v63 }
 0xb85   :  { %1671 = vmatpush.msrb.mxu0 %v2113_v37 }
 0xb86   :  { %v1535_v6 = vpop.permute.xlu2 %1534  ;;  %1586 = vrot.lane.b32.xlu1 %v2910_v32, %s3207_s5 }
 0xb87   :  { %1555 = vmatpush.msra.mxu1 %v1535_v6  ;;  %1672 = vmatpush.msrb.mxu0 %v2112_v2 }
 0xb89   :  { %1673 = vmatpush.msrb.mxu0 %v2111_v41 }
 0xbc0   :  { %v1369_v26 = vpop.xlane.xlu1 %1368 }
 0xbc1   :  { %2289 = vrcp.f32 %v1369_v26 }
 0xbc7   :  { %v2290_v28 = vpop.eup %2289 }
 0xbc8   :  { %v1397_v9 = vmul.f32 %v2290_v28, %v2966_v31  ;;  %v1378_v10 = vpop.xlane.xlu0 %1377 }
 0xbc9   :  { %2291 = vrcp.f32 %v1378_v10 }
 0xbca   :  { %2104 = vmatmul.msk.f32.vlgmr.msrb.gmra.mxu1 %vm214_vm8, %v1397_v9 }
 0xbcf   :  { %v2292_v11 = vpop.eup %2291 }
 0xbd0   :  { %v1400_v57 = vmul.f32 %v2292_v11, %v2276_v39  ;;  %v1372_v53 = vpop.xlane.xlu0 %1371  ;;  %v1375_v47 = vpop.xlane.xlu1 %1374 }
 0xbd1   :  { %2293 = vrcp.f32 %v1372_v53  ;;  %v2122_v53 = vld [vmem:[%s3157_s12 + $0x30] sm:$0xff] }
 0xbd2   :  { %2107 = vmatmul.msk.f32.vlgmr.msra.gmra.mxu0 %vm214_vm8, %v1400_v57 }
 0xbd7   :  { %v2294_v20 = vpop.eup %2293 }
 0xbd8   :  { %v1398_v12 = vmul.f32 %v2294_v20, %v2278_v44  ;;  %v1381_v32 = vpop.xlane.xlu1 %1380  ;;  %v1384_v13 = vpop.xlane.xlu0 %1383  ;;  %v2120_v20 = vld [vmem:[%s3157_s12 + $0x20] sm:$0xff] }
 0xbd9   :  { %2295 = vrcp.f32 %v1381_v32 }
 0xbda   :  { %2105 = vmatmul.msk.f32.vlgmr.msrb.gmra.mxu2 %vm214_vm8, %v1398_v12  ;;  %2297 = vrcp.f32 %v1375_v47  ;;  %v2121_v47 = vld [vmem:[%s3157_s12 + $0x28] sm:$0xff] }
 0xbdb   :  { %2299 = vrcp.f32 %v1384_v13 }
 0xbdf   :  { %v2296_v15 = vpop.eup %2295 }
 0xbe0   :  { %v1401_v42 = vmul.f32 %v2296_v15, %v2284_v51  ;;  %v2298_v35 = vpop.eup %2297  ;;  %v1387_v18 = vpop.xlane.xlu1 %1386 }
 0xbe1   :  { %v2300_v58 = vpop.eup %2299  ;;  %v1399_v24 = vmul.f32 %v2298_v35, %v2971_v45  ;;  %2301 = vrcp.f32 %v1387_v18 }
 0xbe2   :  { %2108 = vmatmul.msk.f32.vlgmr.msra.gmra.mxu1 %vm214_vm8, %v1401_v42  ;;  %v1402_v31 = vmul.f32 %v2300_v58, %v2282_v50 }
 0xbe7   :  { %v2302_v22 = vpop.eup %2301 }
 0xbe8   :  { %v1403_v27 = vmul.f32 %v2302_v22, %v2286_v14 }
 0xbeb   :  { %v2183_v17 = vpop.permute.xlu0 %2182 }
 0xbec   :  { %v2185_v19 = vunpack.i.h.bf16 %v2183_v17  ;;  %v2184_v21 = vunpack.i.l.bf16 %v2183_v17 }
 0xbee   :  { %1503 = vmatpush.msra.mxu3 %v2184_v21  ;;  %1581 = vmatpush.msra.mxu2 %v2185_v19 }
 0xbef   :  { %2106 = vmatmul.msk.f32.vlgmr.msra.gmra.mxu3 %vm214_vm8, %v1399_v24  ;;  %2109 = vmatmul.msk.f32.vlgmr.msra.gmra.mxu2 %vm214_vm8, %v1402_v31  ;;  %v2213_v31 = vld [vmem:[%s3155_s10 + $0x1] ss:$0 sm:$0xff]  ;;  %s2032_s10 = sshll.u32 %s2388_s23, 4  ;;  %s2033_s10 = int_to_ptr.vmem [resolvable:$true] %s2032_s10 }
 0xbf7   :  { %v1427_v25 = vpop.f32.mrf.mxu0 }
 0xbf8   :  { %v1587_v33 = vpop.permute.xlu1 %1586 }
 0xbf9   :  { %1607 = vmatpush.msrb.mxu3 %v1587_v33 }
 0xbfa   :  { %2110 = vmatmul.msk.f32.vlgmr.msrb.gmra.mxu3 %vm214_vm8, %v1403_v27 }
 0xc47   :  { %v1453_v61 = vpop.f32.mrf.mxu1 }
 0xc4f   :  { %v1531_v29 = vpop.f32.mrf.mxu0 }
 0xc50   :  { %1622 = vrot.lane.b32.xlu2 %v1531_v29, %s3208_s27  ;;  %v2214_v29 = vld [vmem:[%s3156_s11 + $0x1] ss:$0 sm:$0xff] }
 0xc5d   :  { %v1479_v34 = vpop.f32.mrf.mxu2 }
 0xc5e   :  { %1614 = vrot.lane.b32.xlu0 %v1479_v34, %s3209_s6 }
 0xc5f   :  { %v1557_v39 = vpop.f32.mrf.mxu1 }
 0xc72   :  { %v1505_v36 = vpop.f32.mrf.mxu3  ;;  %v1583_v38 = vpop.f32.mrf.mxu2 }
 0xc73   :  { %1630 = vrot.lane.b32.xlu0 %v1583_v38, %s3210_s0  ;;  %1616 = vrot.lane.b32.xlu2 %v1505_v36, %s3209_s6 }
 0xc7b   :  { %1624 = vrot.lane.b32.xlu0 %v1557_v39, %s3208_s27 }
 0xc7d   :  { %v1609_v40 = vpop.f32.mrf.mxu3 }
 0xc7e   :  { %1632 = vrot.lane.b32.xlu1 %v1609_v40, %s3210_s0 }
 0xcaa   :  { %v1623_v45 = vpop.permute.xlu2 %1622 }
 0xccd   :  { %v1617_v3 = vpop.permute.xlu2 %1616 }
 0xcce   :  { %v1637_v51 = vsel %vm214_vm8, %v1453_v61, %v1617_v3  ;;  %v2128_v3 = vld [vmem:[%s3159_s14 + $0x48] sm:$0xff] }
 0xcd0   :  { %v1615_v43 = vpop.permute.xlu0 %1614 }
 0xcd1   :  { %v1636_v44 = vsel %vm214_vm8, %v1427_v25, %v1615_v43  ;;  %v2134_v43 = vld [vmem:[%s3159_s14 + $0x78] sm:$0xff] }
 0xcd2   :  { %v1638_v46 = vsel %vm783_vm9, %v1636_v44, %v1623_v45  ;;  %1826 = vmatpush.msrb.mxu2 %v2134_v43  ;;  %v2133_v44 = vld [vmem:[%s3159_s14 + $0x70] sm:$0xff]  ;;  %v2132_v45 = vld [vmem:[%s3159_s14 + $0x68] sm:$0xff] }
 0xcd4   :  { %1827 = vmatpush.msrb.mxu2 %v2133_v44 }
 0xcd6   :  { %1828 = vmatpush.msrb.mxu2 %v2132_v45 }
 0xce5   :  { %v1631_v48 = vpop.permute.xlu0 %1630 }
 0xce6   :  { %v1640_v49 = vsel %vm786_vm10, %v1638_v46, %v1631_v48  ;;  %v2131_v46 = vld [vmem:[%s3159_s14 + $0x60] sm:$0xff]  ;;  %v2130_v48 = vld [vmem:[%s3159_s14 + $0x58] sm:$0xff] }
 0xce7   :  { %2116 = vmatmul.msk.f32.vlgmr.msrb.gmra.mxu0 %vm91_vm0, %v1640_v49  ;;  %1829 = vmatpush.msrb.mxu2 %v2131_v46  ;;  %v2129_v49 = vld [vmem:[%s3159_s14 + $0x50] sm:$0xff] }
 0xce9   :  { %1830 = vmatpush.msrb.mxu2 %v2130_v48 }
 0xceb   :  { %1831 = vmatpush.msrb.mxu2 %v2129_v49 }
 0xced   :  { %v1625_v50 = vpop.permute.xlu0 %1624  ;;  %1832 = vmatpush.msrb.mxu2 %v2128_v3 }
 0xcee   :  { %v1639_v54 = vsel %vm783_vm9, %v1637_v51, %v1625_v50  ;;  %v2127_v50 = vld [vmem:[%s3159_s14 + $0x40] sm:$0xff] }
 0xcef   :  { %1833 = vmatpush.msrb.mxu2 %v2127_v50  ;;  %v2215_v51 = vld [vmem:[%s3158_s13 + $0x1] ss:$0 sm:$0xff] }
 0xcf0   :  { %v1633_v52 = vpop.permute.xlu1 %1632 }
 0xcf1   :  { %v1641_v14 = vsel %vm786_vm10, %v1639_v54, %v1633_v52 }
 0xcf2   :  { %2117 = vmatmul.msk.f32.gmra.mxu0 %vm91_vm0, %v1641_v14 }
 0xd64   :  { %v1675_v56 = vpop.f32.mrf.mxu0 }
 0xd65   :  { %v1676_v59 = vadd.f32 %v2212_v55, %v1675_v56 }
 0xd67   :  { %v1681_v60 = vadd.f32 %v1676_v59, %v2858_v5 }
 0xd69   :  { %v1687_v62 = vsel %vm91_vm0, %v1681_v60, 0.0 }
 0xd6a   :  { %1688 = vadd.xlane.f32.xlu2 %v1687_v62 }
 0xd6f   :  { %v1678_v4 = vpop.f32.mrf.mxu0 }
 0xd70   :  { %v1679_v7 = vadd.f32 %v2212_v55, %v1678_v4 }
 0xd72   :  { %v1682_v30 = vadd.f32 %v1679_v7, %v2863_v0  ;;  %v2123_v0 = vld [vmem:[%s3157_s12 + $0x38] sm:$0xff] }
 0xd73   :  { %1769 = vmatpush.msrb.mxu1 %v2123_v0  ;;  %v2216_v0 = vld [vmem:[%s3160_s15 + $0x1] ss:$0 sm:$0xff] }
 0xd74   :  { %v1690_v8 = vsel %vm91_vm0, %v1682_v30, 0.0 }
 0xd75   :  { %1691 = vadd.xlane.f32.xlu0 %v1690_v8  ;;  %1770 = vmatpush.msrb.mxu1 %v2122_v53 }
 0xd77   :  { %1771 = vmatpush.msrb.mxu1 %v2121_v47 }
 0xd79   :  { %1772 = vmatpush.msrb.mxu1 %v2120_v20 }
 0xddd   :  { %v1689_v23 = vpop.xlane.xlu2 %1688 }
 0xdde   :  { %v1693_v1 = vmul.f32 %v1689_v23, %v2528_v16 }
 0xde0   :  { %v1695_v6 = vsub.f32 %v1681_v60, %v1693_v1 }
 0xde2   :  { %v1697_v26 = vmul.f32 %v1695_v6, %v1695_v6 }
 0xde4   :  { %v1699_v28 = vsel %vm91_vm0, %v1697_v26, 0.0 }
 0xde5   :  { %1700 = vadd.xlane.f32.xlu1 %v1699_v28 }
 0xde8   :  { %v1692_v9 = vpop.xlane.xlu0 %1691 }
 0xde9   :  { %v1694_v5 = vmul.f32 %v1692_v9, %v2528_v16 }
 0xdeb   :  { %v1696_v10 = vsub.f32 %v1682_v30, %v1694_v5 }
 0xded   :  { %v1698_v11 = vmul.f32 %v1696_v10, %v1696_v10 }
 0xdef   :  { %v1702_v57 = vsel %vm91_vm0, %v1698_v11, 0.0 }
 0xdf0   :  { %1703 = vadd.xlane.f32.xlu2 %v1702_v57 }
 0xe58   :  { %v1701_v12 = vpop.xlane.xlu1 %1700 }
 0xe59   :  { %v1705_v32 = vmul.f32 %v1701_v12, %v2528_v16 }
 0xe5b   :  { %v1707_v15 = vadd.f32 1e-12, %v1705_v32 }
 0xe5d   :  { %2303 = vrsqrt.f32 %v1707_v15  ;;  %vm1715_vm9 = vweird.f32 %v1707_v15 }
 0xe63   :  { %v2304_v13 = vpop.eup %2303  ;;  %v1704_v42 = vpop.xlane.xlu2 %1703 }
 0xe64   :  { %v1710_v35 = vmul.f32 %v2304_v13, %v1707_v15  ;;  %v1706_v58 = vmul.f32 %v1704_v42, %v2528_v16  ;;  %vm1716_vm8 = vweird.f32 %v2304_v13 }
 0xe65   :  { %vm1717_vm10 = vmor %vm1715_vm9, %vm1716_vm8  ;;  %vm2014_vm8 = vcmask 0  }
 0xe66   :  { %v1711_v17 = vmul.f32 %v2304_v13, %v1710_v35  ;;  %v1708_v18 = vadd.f32 1e-12, %v1706_v58 }
 0xe68   :  { %v1712_v19 = vmul.f32 0.5, %v1711_v17  ;;  %2305 = vrsqrt.f32 %v1708_v18  ;;  %vm1725_vm13 = vweird.f32 %v1708_v18 }
 0xe6a   :  { %v1713_v21 = vsub.f32 1.5, %v1712_v19 }
 0xe6c   :  { %v1714_v24 = vmul.f32 %v2304_v13, %v1713_v21 }
 0xe6e   :  { %v2306_v22 = vpop.eup %2305  ;;  %v1718_v27 = vsel %vm1717_vm10, %v2304_v13, %v1714_v24 }
 0xe6f   :  { %v1729_v33 = vmul.f32 %v1718_v27, %v1695_v6  ;;  %v1720_v25 = vmul.f32 %v2306_v22, %v1708_v18  ;;  %vm1726_vm12 = vweird.f32 %v2306_v22 }
 0xe70   :  { %vm1727_vm14 = vmor %vm1725_vm13, %vm1726_vm12 }
 0xe71   :  { %v1734_v34 = vmul.f32 %v2213_v31, %v1729_v33  ;;  %v1721_v61 = vmul.f32 %v2306_v22, %v1720_v25 }
 0xe73   :  { %v1722_v36 = vmul.f32 0.5, %v1721_v61  ;;  %v1739_v38 = vadd.f32 %v2214_v29, %v1734_v34  ;;  %v1904_v34 = vld [vmem:[%s3163_s18 + $0x18] sm:$0xff]  ;;  %v1903_v61 = vld [vmem:[%s3163_s18 + $0x10] sm:$0xff] }
 0xe74   :  { %1928 = vmatpush.msra.mxu3 %v1904_v34 }
 0xe75   :  { %v1723_v39 = vsub.f32 1.5, %v1722_v36  ;;  %2125 = vmatmul.msk.f32.vlgmr.msrb.gmra.mxu1 %vm91_vm0, %v1739_v38  ;;  %v1902_v36 = vld [vmem:[%s3163_s18 + $0x8] sm:$0xff] }
 0xe76   :  { %1929 = vmatpush.msra.mxu3 %v1903_v61 }
 0xe77   :  { %v1724_v40 = vmul.f32 %v2306_v22, %v1723_v39 }
 0xe78   :  { %1930 = vmatpush.msra.mxu3 %v1902_v36 }
 0xe79   :  { %v1728_v63 = vsel %vm1727_vm14, %v2306_v22, %v1724_v40 }
 0xe7a   :  { %v1730_v37 = vmul.f32 %v1728_v63, %v1696_v10 }
 0xe7c   :  { %v1735_v2 = vmul.f32 %v2213_v31, %v1730_v37 }
 0xe7e   :  { %v1740_v41 = vadd.f32 %v2214_v29, %v1735_v2 }
 0xe80   :  { %2126 = vmatmul.msk.f32.gmra.mxu1 %vm91_vm0, %v1740_v41 }
 0xef2   :  { %v1774_v54 = vpop.f32.mrf.mxu1 }
 0xef3   :  { %v1775_v52 = vadd.f32 %v2215_v51, %v1774_v54 }
 0xef5   :  { %v1780_v14 = vmul.f32 %v1775_v52, %v1775_v52 }
 0xef7   :  { %v1782_v55 = vmul.f32 %v1780_v14, %v1775_v52 }
 0xef9   :  { %v1784_v56 = vmul.f32 0.044715, %v1782_v55 }
 0xefb   :  { %v1786_v59 = vadd.f32 %v1784_v56, %v1775_v52 }
 0xefd   :  { %v1788_v60 = vmul.f32 0.7978846, %v1786_v59  ;;  %v1777_v62 = vpop.f32.mrf.mxu1 }
 0xefe   :  { %v1778_v4 = vadd.f32 %v2215_v51, %v1777_v62 }
 0xeff   :  { %2307 = vtanh.f32 %v1788_v60  ;;  %v2218_v60 = vld [vmem:[%s3162_s17 + $0x1] ss:$0 sm:$0xff] }
 0xf00   :  { %v1781_v7 = vmul.f32 %v1778_v4, %v1778_v4 }
 0xf02   :  { %v1783_v30 = vmul.f32 %v1781_v7, %v1778_v4 }
 0xf04   :  { %v1785_v8 = vmul.f32 0.044715, %v1783_v30 }
 0xf05   :  { %v2308_v23 = vpop.eup %2307 }
 0xf06   :  { %v1792_v1 = vadd.f32 1.0, %v2308_v23  ;;  %v1787_v6 = vadd.f32 %v1785_v8, %v1778_v4  ;;  %v1940_v8 = vld [vmem:[%s3165_s20 + $0x18] sm:$0xff]  ;;  %v1939_v23 = vld [vmem:[%s3165_s20 + $0x10] sm:$0xff] }
 0xf08   :  { %v1794_v26 = vmul.f32 0.5, %v1792_v1  ;;  %v1789_v28 = vmul.f32 0.7978846, %v1787_v6  ;;  %v1938_v1 = vld [vmem:[%s3165_s20 + $0x8] sm:$0xff]  ;;  %v1937_v6 = vld [vmem:[%s3165_s20] sm:$0xff] }
 0xf0a   :  { %v1796_v9 = vmul.f32 %v1794_v26, %v1775_v52  ;;  %2309 = vtanh.f32 %v1789_v28  ;;  %v2219_v26 = vld [vmem:[%s3164_s19] ss:$0 sm:$0xff] }
 0xf0c   :  { %2136 = vmatmul.msk.f32.vlgmr.msrb.gmra.mxu2 %vm951_vm2, %v1796_v9 }
 0xf10   :  { %v2310_v5 = vpop.eup %2309 }
 0xf11   :  { %v1793_v10 = vadd.f32 1.0, %v2310_v5 }
 0xf13   :  { %v1795_v11 = vmul.f32 0.5, %v1793_v10  ;;  %v2220_v10 = vld [vmem:[%s3166_s21] ss:$0 sm:$0xff]  ;;  %s2386_s21 = smov [#allocation2]  }
 0xf15   :  { %v1797_v57 = vmul.f32 %v1795_v11, %v1778_v4 }
 0xf17   :  { %2137 = vmatmul.msk.f32.gmra.mxu2 %vm951_vm2, %v1797_v57 }
 0xf8f   :  { %v1835_v53 = vpop.f32.mrf.mxu2 }
 0xf90   :  { %v1836_v47 = vadd.f32 %v2216_v0, %v1835_v53  ;;  %v1983_v53 = vld [vmem:[%s3167_s22] sm:$0x3]  ;;  %s2021_s22 = sshll.u32 %s2386_s21, 4  ;;  %s2022_s22 = int_to_ptr.vmem [resolvable:$true] %s2021_s22 }
 0xf92   :  { %v1841_v20 = vadd.f32 %v1836_v47, %v1739_v38  ;;  %v1901_v38 = vld [vmem:[%s3163_s18] sm:$0xff]  ;;  %v2384_v47 = vmov 0  }
 0xf93   :  { %1931 = vmatpush.msra.mxu3 %v1901_v38  ;;  %2191 = vset.pattern.permute.xlu0 %v2384_v47 }
 0xf94   :  { %v1847_v12 = vsel %vm91_vm0, %v1841_v20, 0.0 }
 0xf95   :  { %1848 = vadd.xlane.f32.xlu1 %v1847_v12  ;;  %1960 = vmatpush.msrb.mxu3 %v1940_v8 }
 0xf97   :  { %1961 = vmatpush.msrb.mxu3 %v1939_v23 }
 0xf99   :  { %1962 = vmatpush.msrb.mxu3 %v1938_v1 }
 0xf9a   :  { %v1838_v32 = vpop.f32.mrf.mxu2 }
 0xf9b   :  { %v1839_v15 = vadd.f32 %v2216_v0, %v1838_v32  ;;  %1963 = vmatpush.msrb.mxu3 %v1937_v6 }
 0xf9d   :  { %v1842_v13 = vadd.f32 %v1839_v15, %v1740_v41 }
 0xf9f   :  { %v1850_v42 = vsel %vm91_vm0, %v1842_v13, 0.0 }
 0xfa0   :  { %1851 = vadd.xlane.f32.xlu0 %v1850_v42 }
0x1008   :  { %v1849_v35 = vpop.xlane.xlu1 %1848 }
0x1009   :  { %v1853_v58 = vmul.f32 %v1849_v35, %v2528_v16  ;;  %v1984_v35 = vlaneseq }
0x100b   :  { %v1855_v17 = vsub.f32 %v1841_v20, %v1853_v58  ;;  %v1985_v58 = vand.u32 127, %v1984_v35 }
0x100d   :  { %v1857_v18 = vmul.f32 %v1855_v17, %v1855_v17 }
0x100f   :  { %v1859_v19 = vsel %vm91_vm0, %v1857_v18, 0.0 }
0x1010   :  { %1860 = vadd.xlane.f32.xlu0 %v1859_v19 }
0x1013   :  { %v1852_v21 = vpop.xlane.xlu0 %1851 }
0x1014   :  { %v1854_v24 = vmul.f32 %v1852_v21, %v2528_v16 }
0x1016   :  { %v1856_v31 = vsub.f32 %v1842_v13, %v1854_v24  ;;  %v2385_v24 = vmov 0.0  }
0x1018   :  { %v1858_v22 = vmul.f32 %v1856_v31, %v1856_v31 }
0x101a   :  { %v1862_v27 = vsel %vm91_vm0, %v1858_v22, 0.0 }
0x101b   :  { %1863 = vadd.xlane.f32.xlu2 %v1862_v27 }
0x1024   :  { %1987 = vperm.xlu0 %2191, %v1983_v53  }
0x1083   :  { %v1861_v33 = vpop.xlane.xlu0 %1860 }
0x1084   :  { %v1865_v25 = vmul.f32 %v1861_v33, %v2528_v16 }
0x1086   :  { %v1867_v29 = vadd.f32 1e-12, %v1865_v25  ;;  %v2387_v25 = vmov 2.0  }
0x1088   :  { %2311 = vrsqrt.f32 %v1867_v29  ;;  %vm1875_vm1 = vweird.f32 %v1867_v29 }
0x108e   :  { %v2312_v39 = vpop.eup %2311  ;;  %v1864_v40 = vpop.xlane.xlu2 %1863 }
0x108f   :  { %v1870_v63 = vmul.f32 %v2312_v39, %v1867_v29  ;;  %v1866_v37 = vmul.f32 %v1864_v40, %v2528_v16  ;;  %vm1876_vm15 = vweird.f32 %v2312_v39  ;;  %v2217_v16 = vld [vmem:[%s3161_s16 + $0x1] ss:$0 sm:$0xff] }
0x1090   :  { %vm1877_vm2 = vmor %vm1875_vm1, %vm1876_vm15 }
0x1091   :  { %v1871_v2 = vmul.f32 %v2312_v39, %v1870_v63  ;;  %v1868_v41 = vadd.f32 1e-12, %v1866_v37 }
0x1093   :  { %2313 = vrsqrt.f32 %v1868_v41  ;;  %v1872_v43 = vmul.f32 0.5, %v1871_v2  ;;  %vm1885_vm4 = vweird.f32 %v1868_v41 }
0x1095   :  { %v1873_v44 = vsub.f32 1.5, %v1872_v43 }
0x1097   :  { %v1874_v48 = vmul.f32 %v2312_v39, %v1873_v44 }
0x1099   :  { %v2314_v45 = vpop.eup %2313  ;;  %v1878_v50 = vsel %vm1877_vm2, %v2312_v39, %v1874_v48 }
0x109a   :  { %v1880_v46 = vmul.f32 %v2314_v45, %v1868_v41  ;;  %vm1886_vm3 = vweird.f32 %v2314_v45  ;;  %v1889_v52 = vmul.f32 %v1878_v50, %v1855_v17  ;;  %v1988_v17 = vpop.permute.xlu0 %1987 }
0x109b   :  { %vm1887_vm5 = vmor %vm1885_vm4, %vm1886_vm3 }
0x109c   :  { %v1881_v49 = vmul.f32 %v2314_v45, %v1880_v46  ;;  %v1894_v56 = vmul.f32 %v2217_v16, %v1889_v52 }
0x109e   :  { %v1882_v3 = vmul.f32 0.5, %v1881_v49  ;;  %v1899_v4 = vadd.f32 %v2218_v60, %v1894_v56 }
0x10a0   :  { %v1883_v51 = vsub.f32 1.5, %v1882_v3 }
0x10a2   :  { %v1884_v54 = vmul.f32 %v2314_v45, %v1883_v51 }
0x10a4   :  { %v1888_v14 = vsel %vm1887_vm5, %v2314_v45, %v1884_v54 }
0x10a5   :  { %v1890_v55 = vmul.f32 %v1888_v14, %v1856_v31 }
0x10a7   :  { %v1895_v59 = vmul.f32 %v2217_v16, %v1890_v55 }
0x10a9   :  { %v1900_v62 = vadd.f32 %v2218_v60, %v1895_v59 }
0x10ab   :  { %v1911_v7 = vrot.slane %v1900_v62, 7 }
0x10ad   :  { %v1913_v30 = vsel %vm1912_vm6, %v1911_v7, %v1899_v4 }
0x10ae   :  { %2140 = vmatmul.msk.f32.vlgmr.msra.gmra.mxu3 %vm91_vm0, %v1913_v30 }
0x1131   :  { %v1933_v28 = vpop.f32.mrf.mxu3 }
0x1132   :  { %v1934_v9 = vadd.f32 %v2219_v26, %v1933_v28 }
0x1134   :  { %2315 = vtanh.f32 %v1934_v9 }
0x113a   :  { %v2316_v5 = vpop.eup %2315 }
0x113b   :  { %2141 = vmatmul.msk.f32.vlgmr.msrb.gmra.mxu3 %vm91_vm0, %v2316_v5  ;;  %vm1989_vm0 = vcmp.eq.s32.totalorder %v1985_v58, %v1988_v17 }
0x113c   :  { %v2142_v31 = vsel %vm1989_vm0, 1.0, %v2385_v24 }
0x11be   :  { %v1965_v11 = vpop.f32.mrf.mxu3 }
0x11bf   :  { %v1966_v57 = vadd.f32 %v2220_v10, %v1965_v11 }
0x11c1   :  { %v1970_v0 = vsel %vm1968_vm7, %v1966_v57, -inf  ;;  %1969 = vst.msk [vmem:[#allocation2] sm:$0x3] %vm1968_vm7, %v1966_v57 }
0x11c2   :  { %1971 = vmax.xlane.f32.xlu1 %v1970_v0  ;;  %2026 = dma.vmem_to_hbm [thread:$0]  %s2022_s22, 32, %s2024_s4, [#allocation3]  }
0x1235   :  { %v1972_v20 = vpop.xlane.xlu1 %1971 }
0x1236   :  { %v1973_v12 = vsub.f32 %v1966_v57, %v1972_v20 }
0x1238   :  { %v1974_v32 = vmul.f32 1.442695, %v1973_v12 }
0x123a   :  { %2317 = vpow2.f32 %v1974_v32 }
0x1240   :  { %v2318_v15 = vpop.eup %2317 }
0x1241   :  { %v1976_v13 = vsel %vm1968_vm7, %v2318_v15, 0.0 }
0x1242   :  { %1977 = vadd.xlane.f32.xlu2 %v1976_v13 }
0x12b5   :  { %v1978_v42 = vpop.xlane.xlu2 %1977 }
0x12b6   :  { %2319 = vlog2.f32 %v1978_v42 }
0x12b7   :  { %2321 = vrcp.f32 %v2387_v25 }
0x12bc   :  { %v2320_v18 = vpop.eup %2319 }
0x12bd   :  { %v1980_v19 = vmul.f32 0.6931472, %v2320_v18  ;;  %v2322_v29 = vpop.eup %2321 }
0x12be   :  { %v2005_v34 = vmul.f32 2.0, %v2322_v29  ;;  %vm2009_vm11 = vweird.f32 %v2322_v29 }
0x12bf   :  { %v1981_v21 = vadd.f32 %v1980_v19, %v1972_v20 }
0x12c0   :  { %v2006_v61 = vsub.f32 1.0, %v2005_v34 }
0x12c1   :  { %v1982_v22 = vsub.f32 %v1966_v57, %v1981_v21 }
0x12c2   :  { %v2007_v40 = vmul.f32 %v2322_v29, %v2006_v61 }
0x12c3   :  { %v1992_v27 = vmul.f32 %v2142_v31, %v1982_v22 }
0x12c4   :  { %v2008_v2 = vadd.f32 %v2322_v29, %v2007_v40 }
0x12c5   :  { %v1993_v33 = vsel %vm1968_vm7, %v1992_v27, 0.0 }
0x12c6   :  { %1994 = vadd.xlane.f32.xlu1 %v1993_v33  ;;  %v2010_v44 = vsel %vm2009_vm11, %v2322_v29, %v2008_v2 }
0x1339   :  { %v1995_v36 = vpop.xlane.xlu1 %1994 }
0x133a   :  { %v1996_v38 = vrot.slane %v1995_v36, 4 }
0x133c   :  { %v1997_v39 = vadd.f32 %v1996_v38, %v1995_v36 }
0x133e   :  { %v1998_v63 = vrot.slane %v1997_v39, 2 }
0x1340   :  { %v1999_v37 = vadd.f32 %v1998_v63, %v1997_v39 }
0x1342   :  { %v2000_v41 = vrot.slane %v1999_v37, 1 }
0x1344   :  { %v2001_v43 = vadd.f32 %v2000_v41, %v1999_v37 }
0x1346   :  { %2143 = vpush %v2001_v43 }
0x1347   :  { %2145 = vpush %v2010_v44 }
0x1377   :  { %s2144_s25 = spop %2143 }
0x1378   :  { %s2003_s3 = ssub.f32 0.0, %s2144_s25  ;;  %s2146_s18 = spop %2145 }
0x137a   :  { %s2012_s28 = smul.f32 %s2146_s18, %s2003_s3 }
0x137c   :  { %v2013_v45 = vstv %s2012_s28 }
0x137d   :  { %2015 = vst.msk [vmem:[#allocation4] sm:$0x1] %vm2014_vm8, %v2013_v45 }
0x137e   :  { %2037 = dma.vmem_to_hbm [thread:$0]  %s2033_s10, 16, %s2035_s26, [#allocation5]  }
0x137f   :  { %2371 = dma.done.wait [#allocation3], 32  }
0x1380   :  { %2372 = vsyncadd [#allocation3], 4294967264 }
0x1381   :  { %2373 = dma.done.wait [#allocation5], 16  }
0x1382   :  { %2374 = vsyncadd [#allocation5], 4294967280 }
0x1383   :  { %2046 = vsyncpa [#allocation3], 1 }
0x1384   :  { %2047 = vsyncpa [#allocation5], 1 }

</bundles_post_ra>
